<compile_context>
chip_gen: v6e
topology: v6e:2x2x1
jax: 0.10.0
libtpu: 0.0.40
codegen_flags: <defaults>
</compile_context>

<pallas_src>
import math
from functools import partial

import jax
import jax.numpy as jnp
from jax import lax
from jax.experimental import pallas as pl
from jax.experimental.pallas import tpu as pltpu


# ---------------------------------------------------------------------------
# Shared helpers for the "wide matmul + zero-haloed tap reads" SAME conv.
# ---------------------------------------------------------------------------
def _halo_rows(W, kh, kw):
    """Zero-halo rows above/below a flattened (H*W) frame so that every tap
    offset oy*W+ox stays inside the scratch buffer; rounded to the sublane
    tile so the interior write stays 8-row aligned."""
    need = (kh // 2) * W + (kw // 2)
    return ((need + 7) // 8) * 8


def _edge_masks(H, W, kw, c4):
    """Per-ox validity masks (True where x+ox stays inside the image row).
    Only the horizontal wrap of the flattened-row shift needs masking; the
    vertical boundary is handled by the zero halo rows of the tap scratch."""
    xpos = lax.broadcasted_iota(jnp.int32, (H * W, c4), 0) % W
    return {ox: (xpos + ox >= 0) & (xpos + ox < W)
            for ox in range(-(kw // 2), kw // 2 + 1) if ox != 0}


def _accum_taps(yw_ref, acc, masks, *, H, W, kh, kw, c4, pad):
    """acc += SAME-conv output assembled from per-tap matmul results.

    yw_ref rows [pad, pad+H*W) hold, for every pixel p, the kh*kw per-tap
    partial products (tap k occupies the lane block [k*c4, (k+1)*c4)).  The
    conv output at pixel p for tap (oy, ox) is yw[p + oy*W + ox, tap k]: a
    lane-aligned, sublane-offset read from the zero-haloed scratch.  Rows that
    fall outside the frame read zeros from the halo; the per-row horizontal
    wrap is removed with a cheap VPU mask."""
    HW = H * W
    k = 0
    for oy in range(-(kh // 2), kh // 2 + 1):
        for ox in range(-(kw // 2), kw // 2 + 1):
            s = pad + oy * W + ox
            yk = yw_ref[s:s + HW, k * c4:(k + 1) * c4]
            if ox != 0:
                yk = jnp.where(masks[ox], yk, 0.0)
            acc = acc + yk
            k += 1
    return acc


# ---------------------------------------------------------------------------
# Kernel 1: x-path gate pre-activations, one (b, t) frame per grid step.
# ---------------------------------------------------------------------------
def _xgate_kernel(x_ref, w_ref, b_ref, o_ref, yw_scr, *, H, W, kh, kw, pad):
    HW = H * W
    C4 = o_ref.shape[-1]

    if pad > 0:                                   # zero halo rows (once per call)
        zero_band = jnp.zeros((pad, yw_scr.shape[1]), jnp.float32)
        yw_scr[0:pad, :] = zero_band
        yw_scr[pad + HW:pad + HW + pad, :] = zero_band

    # One MXU matmul for all kh*kw taps: (HW, Cin) @ (Cin, kh*kw*4Ch), bf16 in,
    # f32 accumulate, aligned store into the scratch interior.
    yw_scr[pad:pad + HW, :] = jnp.dot(
        x_ref[...], w_ref[...], preferred_element_type=jnp.float32)

    masks = _edge_masks(H, W, kw, C4)
    acc = _accum_taps(yw_scr, jnp.zeros((HW, C4), jnp.float32), masks,
                      H=H, W=W, kh=kh, kw=kw, c4=C4, pad=pad)
    o_ref[...] = (acc + b_ref[...]).astype(o_ref.dtype)   # bias folded once


def xgate_conv(x_bthwc, wx, b, kernel_size):
    """conv2d(x, Wx, SAME) + b for every (b, t) frame -> (B, T, HW, 4Ch) bf16."""
    B, T, H, W, Cin = x_bthwc.shape
    kh, kw = kernel_size
    C4 = wx.shape[-1]                      # 4 * hidden
    HW = H * W
    pad = _halo_rows(W, kh, kw)

    xr = x_bthwc.reshape(B * T, HW, Cin).astype(jnp.bfloat16)
    # tap-major weight layout: wide[c, k*C4 + n] = wx[dy, dx, c, n], k = dy*kw+dx
    wxw = jnp.transpose(wx, (2, 0, 1, 3)).reshape(Cin, kh * kw * C4)
    wxw = wxw.astype(jnp.bfloat16)
    bias = b.reshape(1, C4).astype(jnp.float32)

    kern = partial(_xgate_kernel, H=H, W=W, kh=kh, kw=kw, pad=pad)
    xg = pl.pallas_call(
        kern,
        out_shape=jax.ShapeDtypeStruct((B * T, HW, C4), jnp.bfloat16),
        grid_spec=pltpu.PrefetchScalarGridSpec(
            num_scalar_prefetch=0,
            grid=(B * T,),                 # 16 steps: DMA/compute overlap + 2 TCs
            in_specs=[
                pl.BlockSpec((None, HW, Cin), lambda i: (i, 0, 0)),
                pl.BlockSpec((Cin, kh * kw * C4), lambda i: (0, 0)),
                pl.BlockSpec((1, C4), lambda i: (0, 0)),
            ],
            out_specs=pl.BlockSpec((None, HW, C4), lambda i: (i, 0, 0)),
            scratch_shapes=[
                pltpu.VMEM((2 * pad + HW, kh * kw * C4), jnp.float32),
            ],
        ),
        compiler_params=pltpu.CompilerParams(
            dimension_semantics=("parallel",)),
    )(xr, wxw, bias)
    return xg.reshape(B, T, HW, C4)


# ---------------------------------------------------------------------------
# Kernel 2: the recurrence.  One grid step per batch element; h/c live in VMEM
# scratch; the per-step h-path conv is one wide bf16 matmul + halo tap reads.
# ---------------------------------------------------------------------------
def _recurrent_kernel(xg_ref, wh_ref, h_all_ref, c_last_ref,
                      h_scr, c_scr, yw_scr, *, H, W, kh, kw, Ch, pad):
    T = xg_ref.shape[0]
    HW = H * W
    C4 = 4 * Ch

    # Fresh zero state per batch element (matches ConvLSTMCell._init_hidden);
    # scratch persists across grid steps so it must be re-zeroed here.
    h_scr[...] = jnp.zeros_like(h_scr)
    c_scr[...] = jnp.zeros_like(c_scr)

    if pad > 0:                                   # zero halo rows once per batch
        zero_band = jnp.zeros((pad, yw_scr.shape[1]), jnp.float32)
        yw_scr[0:pad, :] = zero_band
        yw_scr[pad + HW:pad + HW + pad, :] = zero_band

    # Loop-invariant patterns, hoisted out of the time loop.
    masks = _edge_masks(H, W, kw, C4)
    lane = lax.broadcasted_iota(jnp.int32, (HW, C4), 1)
    pre_scale = jnp.where(lane < 3 * Ch, 0.5, 1.0)   # sigmoid(x)=0.5*tanh(x/2)+0.5

    def step(t, carry):
        # h-path conv: ONE wide MXU matmul over all taps (bf16 operands, f32
        # accumulate), written aligned into the zero-haloed scratch interior.
        yw_scr[pad:pad + HW, :] = jnp.dot(
            h_scr[...], wh_ref[...], preferred_element_type=jnp.float32)

        acc = xg_ref[t].astype(jnp.float32)           # x-path + bias, precomputed
        acc = _accum_taps(yw_scr, acc, masks,
                          H=H, W=W, kh=kh, kw=kw, c4=C4, pad=pad)

        # One dense (HW, 4Ch) tanh for all four gates; gate order [i|f|o|g]
        # matches torch.split(combined_conv, hidden, dim=1).
        z = jnp.tanh(acc * pre_scale)
        zs = 0.5 * z + 0.5                            # sigmoid lanes (i, f, o)
        i = zs[:, 0 * Ch:1 * Ch]
        f = zs[:, 1 * Ch:2 * Ch]
        o = zs[:, 2 * Ch:3 * Ch]
        g = z[:, 3 * Ch:4 * Ch]

        c = f * c_scr[...] + i * g
        h = o * jnp.tanh(c)

        c_scr[...] = c
        h_scr[...] = h.astype(h_scr.dtype)            # bf16 operand for next step
        # (HW, Ch) store; see header note on why the lane-dense relayout store
        # was not adopted at Ch=32.
        h_all_ref[t] = h
        return carry

    lax.fori_loop(0, T, step, 0, unroll=True)
    c_last_ref[...] = c_scr[...]                      # written once, at the end


def convlstm_recurrence(xg, wh, kernel_size, H, W):
    B, T, HW, C4 = xg.shape
    kh, kw = kernel_size
    Ch = C4 // 4
    pad = _halo_rows(W, kh, kw)
    whw = jnp.transpose(wh, (2, 0, 1, 3)).reshape(Ch, kh * kw * C4)
    whw = whw.astype(jnp.bfloat16)

    kern = partial(_recurrent_kernel, H=H, W=W, kh=kh, kw=kw, Ch=Ch, pad=pad)
    h_all, c_last = pl.pallas_call(
        kern,
        out_shape=(
            jax.ShapeDtypeStruct((B, T, HW, Ch), jnp.float32),   # h for every t
            jax.ShapeDtypeStruct((B, HW, Ch), jnp.float32),      # final c
        ),
        grid_spec=pltpu.PrefetchScalarGridSpec(
            num_scalar_prefetch=0,
            grid=(B,),
            in_specs=[
                pl.BlockSpec((None, T, HW, C4), lambda b: (b, 0, 0, 0)),
                pl.BlockSpec((Ch, kh * kw * C4), lambda b: (0, 0)),
            ],
            out_specs=[
                pl.BlockSpec((None, T, HW, Ch), lambda b: (b, 0, 0, 0)),
                pl.BlockSpec((None, HW, Ch), lambda b: (b, 0, 0)),
            ],
            scratch_shapes=[
                pltpu.VMEM((HW, Ch), jnp.bfloat16),              # hidden state
                pltpu.VMEM((HW, Ch), jnp.float32),               # cell state
                pltpu.VMEM((2 * pad + HW, kh * kw * C4), jnp.float32),  # taps
            ],
        ),
        compiler_params=pltpu.CompilerParams(
            dimension_semantics=("parallel",)),                  # v7x: B over 2 TCs
    )(xg, whw)
    return h_all, c_last


# ---------------------------------------------------------------------------
# Full forward (batch_first=True, hidden_state=[] -> zeros).
# ---------------------------------------------------------------------------
def convlstm_forward(x_bcthw, params, kernel_size):
    # TODO(synk): external (non-zero) initial hidden_state is not supported;
    # zeros init only, matching the PyTorch default hidden_state=[].
    kh, kw = kernel_size
    assert kh % 2 == 1 and kw % 2 == 1, "odd kernel sizes only (SAME padding)"
    B, C, T, H, W = x_bcthw.shape
    cur = jnp.transpose(x_bcthw, (0, 2, 3, 4, 1)).astype(jnp.float32)  # (B,T,H,W,C)
    last_state_list = []
    for (wx, wh, b) in params:
        Ch = wh.shape[2]
        xg = xgate_conv(cur, wx, b, kernel_size)             # (B,T,HW,4Ch) bf16
        h_all, c_last = convlstm_recurrence(xg, wh, kernel_size, H, W)
        cur = h_all.reshape(B, T, H, W, Ch)
        h_last = cur[:, -1]                                  # (B,H,W,Ch)
        c_last = c_last.reshape(B, H, W, Ch)
        last_state_list.append((jnp.transpose(h_last, (0, 3, 1, 2)),   # NCHW
                                jnp.transpose(c_last, (0, 3, 1, 2))))  # NCHW
    layer_output = jnp.transpose(cur, (0, 4, 1, 2, 3))       # (B, Ch_last, T, H, W)
    return layer_output, last_state_list


def init_params(key, input_channels, hidden_channels_list, kernel_size):
    """Deterministic Conv2d-style init: uniform(-1/sqrt(fan_in), 1/sqrt(fan_in))."""
    kh, kw = kernel_size
    params = []
    cin = input_channels
    for ch in hidden_channels_list:
        fan_in = (cin + ch) * kh * kw
        bound = 1.0 / math.sqrt(fan_in)
        key, k1, k2, k3 = jax.random.split(key, 4)
        wx = jax.random.uniform(k1, (kh, kw, cin, 4 * ch), jnp.float32, -bound, bound)
        wh = jax.random.uniform(k2, (kh, kw, ch, 4 * ch), jnp.float32, -bound, bound)
        b = jax.random.uniform(k3, (4 * ch,), jnp.float32, -bound, bound)
        params.append((wx, wh, b))
        cin = ch
    return params


def _ref_forward(x_bcthw, params, kernel_size):
    """Pure-JAX reference (lax.conv, f32 HIGHEST) mirroring the PyTorch math."""
    B, C, T, H, W = x_bcthw.shape
    cur = jnp.transpose(x_bcthw, (0, 2, 3, 4, 1)).astype(jnp.float32)
    dn = ('NHWC', 'HWIO', 'NHWC')
    hi = lax.Precision.HIGHEST
    last = []
    for (wx, wh, b) in params:
        Ch = wh.shape[2]
        h = jnp.zeros((B, H, W, Ch), jnp.float32)
        c = jnp.zeros((B, H, W, Ch), jnp.float32)
        outs = []
        for t in range(T):
            xt = cur[:, t]
            y = (lax.conv_general_dilated(xt, wx, (1, 1), 'SAME',
                                          dimension_numbers=dn, precision=hi)
                 + lax.conv_general_dilated(h, wh, (1, 1), 'SAME',
                                            dimension_numbers=dn, precision=hi)
                 + b[None, None, None, :])
            i = jax.nn.sigmoid(y[..., 0 * Ch:1 * Ch])
            f = jax.nn.sigmoid(y[..., 1 * Ch:2 * Ch])
            o = jax.nn.sigmoid(y[..., 2 * Ch:3 * Ch])
            g = jnp.tanh(y[..., 3 * Ch:4 * Ch])
            c = f * c + i * g
            h = o * jnp.tanh(c)
            outs.append(h)
        cur = jnp.stack(outs, axis=1)
        last.append((jnp.transpose(h, (0, 3, 1, 2)), jnp.transpose(c, (0, 3, 1, 2))))
    return jnp.transpose(cur, (0, 4, 1, 2, 3)), last


if __name__ == "__main__":
    # Raw input (B, C, T, H, W) = (2, 4, 8, 16, 16); two stacked layers with
    # hidden channels [32, 32] (so 4*Ch = 128 is lane-dense), kernel (3, 3).
    B, C, T, H, W = 2, 4, 8, 16, 16
    hidden = [32, 32]
    ksize = (3, 3)

    key = jax.random.PRNGKey(0)
    kx, kp = jax.random.split(key)
    x = jax.random.normal(kx, (B, C, T, H, W), jnp.float32)
    params = init_params(kp, C, hidden, ksize)

    out, last_states = convlstm_forward(x, params, ksize)
    out = jax.block_until_ready(out)

    # Sanity check against a pure-JAX f32 (HIGHEST) reference of the same math.
    # The kernels use bf16 MXU operands with f32 accumulation (per perf review),
    # so the budget is 2e-2 absolute; real bugs (wrong tap/gate/mask) produce
    # errors two orders of magnitude larger.
    ref_out, ref_last = _ref_forward(x, params, ksize)
    err = float(jnp.max(jnp.abs(out - ref_out)))
    for (h_k, c_k), (h_r, c_r) in zip(last_states, ref_last):
        err = max(err, float(jnp.max(jnp.abs(h_k - h_r))))
        err = max(err, float(jnp.max(jnp.abs(c_k - c_r))))
    assert err < 2e-2, f"mismatch vs reference: {err}"
    assert out.shape == (B, hidden[-1], T, H, W)

    print("KERNEL_OK")
</pallas_src>

<mosaic_0001>
module attributes {stable_mosaic.version = 11 : i64} {
  func.func @_xgate_kernel(%arg0: i32, %arg1: memref<1x256x4xbf16, #tpu.memory_space<vmem>>, %arg2: memref<4x1152xbf16, #tpu.memory_space<vmem>>, %arg3: memref<1x128xf32, #tpu.memory_space<vmem>>, %arg4: memref<1x256x128xbf16, #tpu.memory_space<vmem>>, %arg5: memref<304x1152xf32, #tpu.memory_space<vmem>>) attributes {dimension_semantics = [#tpu.dimension_semantics<parallel>], iteration_bounds = array<i64: 16>, scalar_prefetch = 0 : i64, scratch_operands = 1 : i64, tpu.core_type = #tpu.core_type<tc>, window_params = [{transform_indices = @transform_0, window_bounds = array<i64: 1, 256, 4>}, {pipeline_mode = #tpu.pipeline_mode<synchronous>, transform_indices = @transform_1, window_bounds = array<i64: 4, 1152>}, {pipeline_mode = #tpu.pipeline_mode<synchronous>, transform_indices = @transform_2, window_bounds = array<i64: 1, 128>}, {transform_indices = @transform_3, window_bounds = array<i64: 1, 256, 128>}]} {
    %cst = arith.constant 0.000000e+00 : f32
    %0 = vector.broadcast %cst : f32 to vector<24x1152xf32>
    %c0 = arith.constant 0 : index
    %c0_0 = arith.constant 0 : index
    %1 = vector.load %arg5[%c0, %c0_0] : memref<304x1152xf32, #tpu.memory_space<vmem>>, vector<24x1152xf32>
    tpu.vector_store %arg5[%c0, %c0_0], %0 {strides = array<i32>} : memref<304x1152xf32, #tpu.memory_space<vmem>>, vector<24x1152xf32>,
    %c280 = arith.constant 280 : index
    %c0_1 = arith.constant 0 : index
    %2 = vector.load %arg5[%c280, %c0_1] : memref<304x1152xf32, #tpu.memory_space<vmem>>, vector<24x1152xf32>
    tpu.vector_store %arg5[%c280, %c0_1], %0 {strides = array<i32>} : memref<304x1152xf32, #tpu.memory_space<vmem>>, vector<24x1152xf32>,
    %c0_2 = arith.constant 0 : index
    %c0_3 = arith.constant 0 : index
    %c0_4 = arith.constant 0 : index
    %3 = vector.load %arg1[%c0_2, %c0_3, %c0_4] : memref<1x256x4xbf16, #tpu.memory_space<vmem>>, vector<1x256x4xbf16>
    %4 = vector.shape_cast %3 : vector<1x256x4xbf16> to vector<256x4xbf16>
    %c0_5 = arith.constant 0 : index
    %c0_6 = arith.constant 0 : index
    %5 = vector.load %arg2[%c0_5, %c0_6] : memref<4x1152xbf16, #tpu.memory_space<vmem>>, vector<4x1152xbf16>
    %cst_7 = arith.constant dense<0.000000e+00> : vector<256x1152xf32>
    %6 = tpu.matmul %4, %5, %cst_7 {dimension_numbers = #tpu.dot_dimension_numbers<[1], [0], [0], [1], [0, 0, 1, 1], [], []>} : vector<256x4xbf16>, vector<4x1152xbf16>, vector<256x1152xf32> -> vector<256x1152xf32>
    %c24 = arith.constant 24 : index
    %c0_8 = arith.constant 0 : index
    %7 = vector.load %arg5[%c24, %c0_8] : memref<304x1152xf32, #tpu.memory_space<vmem>>, vector<256x1152xf32>
    tpu.vector_store %arg5[%c24, %c0_8], %6 {strides = array<i32>} : memref<304x1152xf32, #tpu.memory_space<vmem>>, vector<256x1152xf32>,
    %8 = tpu.iota {dimensions = array<i32: 0>} : vector<256x128xi32>
    %c16_i32 = arith.constant 16 : i32
    %c0_i32 = arith.constant 0 : i32
    %9 = arith.cmpi eq, %c16_i32, %c0_i32 : i32
    %c1_i32 = arith.constant 1 : i32
    %10 = arith.select %9, %c1_i32, %c16_i32 : i32
    %11 = vector.broadcast %10 : i32 to vector<256x128xi32>
    %12 = arith.remsi %8, %11 : vector<256x128xi32>
    %c0_i32_9 = arith.constant 0 : i32
    %13 = vector.broadcast %c0_i32_9 : i32 to vector<256x128xi32>
    %14 = arith.cmpi ne, %12, %13 : vector<256x128xi32>
    %c0_i32_10 = arith.constant 0 : i32
    %15 = vector.broadcast %c0_i32_10 : i32 to vector<256x128xi32>
    %16 = arith.cmpi slt, %12, %15 : vector<256x128xi32>
    %c0_i32_11 = arith.constant 0 : i32
    %17 = arith.cmpi slt, %10, %c0_i32_11 : i32
    %18 = vector.broadcast %17 : i1 to vector<256x128xi1>
    %19 = vector.broadcast %18 : vector<256x128xi1> to vector<256x128xi1>
    %20 = arith.xori %16, %19 : vector<256x128xi1>
    %21 = arith.andi %20, %14 : vector<256x128xi1>
    %22 = vector.broadcast %10 : i32 to vector<256x128xi32>
    %23 = arith.addi %12, %22 : vector<256x128xi32>
    %24 = arith.select %21, %23, %12 : vector<256x128xi1>, vector<256x128xi32>
    %c-1_i32 = arith.constant -1 : i32
    %25 = vector.broadcast %c-1_i32 : i32 to vector<256x128xi32>
    %26 = arith.addi %24, %25 : vector<256x128xi32>
    %c0_i32_12 = arith.constant 0 : i32
    %27 = vector.broadcast %c0_i32_12 : i32 to vector<256x128xi32>
    %28 = arith.cmpi sge, %26, %27 : vector<256x128xi32>
    %c-1_i32_13 = arith.constant -1 : i32
    %29 = vector.broadcast %c-1_i32_13 : i32 to vector<256x128xi32>
    %30 = arith.addi %24, %29 : vector<256x128xi32>
    %c16_i32_14 = arith.constant 16 : i32
    %31 = vector.broadcast %c16_i32_14 : i32 to vector<256x128xi32>
    %32 = arith.cmpi slt, %30, %31 : vector<256x128xi32>
    %33 = arith.andi %28, %32 : vector<256x128xi1>
    %c1_i32_15 = arith.constant 1 : i32
    %34 = vector.broadcast %c1_i32_15 : i32 to vector<256x128xi32>
    %35 = arith.addi %24, %34 : vector<256x128xi32>
    %c0_i32_16 = arith.constant 0 : i32
    %36 = vector.broadcast %c0_i32_16 : i32 to vector<256x128xi32>
    %37 = arith.cmpi sge, %35, %36 : vector<256x128xi32>
    %c1_i32_17 = arith.constant 1 : i32
    %38 = vector.broadcast %c1_i32_17 : i32 to vector<256x128xi32>
    %39 = arith.addi %24, %38 : vector<256x128xi32>
    %c16_i32_18 = arith.constant 16 : i32
    %40 = vector.broadcast %c16_i32_18 : i32 to vector<256x128xi32>
    %41 = arith.cmpi slt, %39, %40 : vector<256x128xi32>
    %42 = arith.andi %37, %41 : vector<256x128xi1>
    %cst_19 = arith.constant 0.000000e+00 : f32
    %43 = vector.broadcast %cst_19 : f32 to vector<256x128xf32>
    %c7 = arith.constant 7 : index
    %c0_20 = arith.constant 0 : index
    %44 = vector.load %arg5[%c7, %c0_20] : memref<304x1152xf32, #tpu.memory_space<vmem>>, vector<256x128xf32>
    %cst_21 = arith.constant 0.000000e+00 : f32
    %45 = vector.broadcast %cst_21 : f32 to vector<256x128xf32>
    %46 = arith.select %33, %44, %45 : vector<256x128xi1>, vector<256x128xf32>
    %47 = arith.addf %43, %46 : vector<256x128xf32>
    %c8 = arith.constant 8 : index
    %c128 = arith.constant 128 : index
    %48 = vector.load %arg5[%c8, %c128] : memref<304x1152xf32, #tpu.memory_space<vmem>>, vector<256x128xf32>
    %49 = arith.addf %47, %48 : vector<256x128xf32>
    %c9 = arith.constant 9 : index
    %c256 = arith.constant 256 : index
    %50 = vector.load %arg5[%c9, %c256] : memref<304x1152xf32, #tpu.memory_space<vmem>>, vector<256x128xf32>
    %cst_22 = arith.constant 0.000000e+00 : f32
    %51 = vector.broadcast %cst_22 : f32 to vector<256x128xf32>
    %52 = arith.select %42, %50, %51 : vector<256x128xi1>, vector<256x128xf32>
    %53 = arith.addf %49, %52 : vector<256x128xf32>
    %c23 = arith.constant 23 : index
    %c384 = arith.constant 384 : index
    %54 = vector.load %arg5[%c23, %c384] : memref<304x1152xf32, #tpu.memory_space<vmem>>, vector<256x128xf32>
    %cst_23 = arith.constant 0.000000e+00 : f32
    %55 = vector.broadcast %cst_23 : f32 to vector<256x128xf32>
    %56 = arith.select %33, %54, %55 : vector<256x128xi1>, vector<256x128xf32>
    %57 = arith.addf %53, %56 : vector<256x128xf32>
    %c24_24 = arith.constant 24 : index
    %c512 = arith.constant 512 : index
    %58 = vector.load %arg5[%c24_24, %c512] : memref<304x1152xf32, #tpu.memory_space<vmem>>, vector<256x128xf32>
    %59 = arith.addf %57, %58 : vector<256x128xf32>
    %c25 = arith.constant 25 : index
    %c640 = arith.constant 640 : index
    %60 = vector.load %arg5[%c25, %c640] : memref<304x1152xf32, #tpu.memory_space<vmem>>, vector<256x128xf32>
    %cst_25 = arith.constant 0.000000e+00 : f32
    %61 = vector.broadcast %cst_25 : f32 to vector<256x128xf32>
    %62 = arith.select %42, %60, %61 : vector<256x128xi1>, vector<256x128xf32>
    %63 = arith.addf %59, %62 : vector<256x128xf32>
    %c39 = arith.constant 39 : index
    %c768 = arith.constant 768 : index
    %64 = vector.load %arg5[%c39, %c768] : memref<304x1152xf32, #tpu.memory_space<vmem>>, vector<256x128xf32>
    %cst_26 = arith.constant 0.000000e+00 : f32
    %65 = vector.broadcast %cst_26 : f32 to vector<256x128xf32>
    %66 = arith.select %33, %64, %65 : vector<256x128xi1>, vector<256x128xf32>
    %67 = arith.addf %63, %66 : vector<256x128xf32>
    %c40 = arith.constant 40 : index
    %c896 = arith.constant 896 : index
    %68 = vector.load %arg5[%c40, %c896] : memref<304x1152xf32, #tpu.memory_space<vmem>>, vector<256x128xf32>
    %69 = arith.addf %67, %68 : vector<256x128xf32>
    %c41 = arith.constant 41 : index
    %c1024 = arith.constant 1024 : index
    %70 = vector.load %arg5[%c41, %c1024] : memref<304x1152xf32, #tpu.memory_space<vmem>>, vector<256x128xf32>
    %cst_27 = arith.constant 0.000000e+00 : f32
    %71 = vector.broadcast %cst_27 : f32 to vector<256x128xf32>
    %72 = arith.select %42, %70, %71 : vector<256x128xi1>, vector<256x128xf32>
    %73 = arith.addf %69, %72 : vector<256x128xf32>
    %c0_28 = arith.constant 0 : index
    %c0_29 = arith.constant 0 : index
    %74 = vector.load %arg3[%c0_28, %c0_29] : memref<1x128xf32, #tpu.memory_space<vmem>>, vector<1x128xf32>
    %75 = vector.broadcast %74 : vector<1x128xf32> to vector<256x128xf32>
    %76 = arith.addf %73, %75 : vector<256x128xf32>
    %77 = arith.truncf %76 : vector<256x128xf32> to vector<256x128xbf16>
    %c0_30 = arith.constant 0 : index
    %c0_31 = arith.constant 0 : index
    %c0_32 = arith.constant 0 : index
    %78 = vector.load %arg4[%c0_30, %c0_31, %c0_32] : memref<1x256x128xbf16, #tpu.memory_space<vmem>>, vector<1x256x128xbf16>
    %79 = vector.shape_cast %78 : vector<1x256x128xbf16> to vector<256x128xbf16>
    %80 = vector.shape_cast %77 : vector<256x128xbf16> to vector<1x256x128xbf16>
    tpu.vector_store %arg4[%c0_30, %c0_31, %c0_32], %80 {strides = array<i32>} : memref<1x256x128xbf16, #tpu.memory_space<vmem>>, vector<1x256x128xbf16>,
    return
  }
  func.func @transform_0(%arg0: i32) -> (i32, i32, i32) {
    %c0_i32 = arith.constant 0 : i32
    %c0_i32_0 = arith.constant 0 : i32
    %c0_i32_1 = arith.constant 0 : i32
    return %arg0, %c0_i32, %c0_i32_0 : i32, i32, i32
  }
  func.func @transform_1(%arg0: i32) -> (i32, i32) {
    %c0_i32 = arith.constant 0 : i32
    %c0_i32_0 = arith.constant 0 : i32
    %c0_i32_1 = arith.constant 0 : i32
    return %c0_i32, %c0_i32_0 : i32, i32
  }
  func.func @transform_2(%arg0: i32) -> (i32, i32) {
    %c0_i32 = arith.constant 0 : i32
    %c0_i32_0 = arith.constant 0 : i32
    %c0_i32_1 = arith.constant 0 : i32
    return %c0_i32, %c0_i32_0 : i32, i32
  }
  func.func @transform_3(%arg0: i32) -> (i32, i32, i32) {
    %c0_i32 = arith.constant 0 : i32
    %c0_i32_0 = arith.constant 0 : i32
    %c0_i32_1 = arith.constant 0 : i32
    return %arg0, %c0_i32, %c0_i32_0 : i32, i32, i32
  }
}

</mosaic_0001>

<bundles_post_ra>
// kernel: tpu_custom_call.1
= control target key start
LH: loop header
LB: loop body
LE: loop exit
PB: predicated region body
PF: predicated region fallthrough
CT: control target
= control target key end

     0   :  { %8 = vsyncpa [#allocation4], 0  ;;  %s6195_s0 = inlined_call_operand.vmem [shape: bf16[16,256,4], index: 0, kind: input, shape index: {}]   ;;  %s6196_s1 = inlined_call_operand.vmem [shape: bf16[4,1152], index: 1, kind: input, shape index: {}]   ;;  %s6197_s2 = inlined_call_operand.vmem [shape: f32[1,128], index: 2, kind: input, shape index: {}]   ;;  %s6198_s3 = inlined_call_operand.hbm [shape: bf16[16,256,128], index: 3, kind: output, shape index: {}]  }
   0x1   :  { %10 = vsyncpa [#allocation4 + $0x1], 0  ;;  %s4671_s12 = smov 0   ;;  %s4673_s13 = smov 0  }
   0x2   :  { %s4675_s14 = smov 0   ;;  %s4677_s15 = smov 0  }
   0x3 LB: > { %s4692_s16 = sadd.s32 4294967295, %s4643_s15   ;;  %s4185_s17 = sadd.s32 4294967294, %s4643_s15   ;;  %s4643_s15 = sphi %s4677_s15, %s6400_s15   ;;  %s4639_s14 = sphi %s4675_s14, %s6399_s14   ;;  %s4635_s13 = sphi %s4673_s13, %s6398_s13   ;;  %s4631_s12 = sphi %s4671_s12, %s6397_s12  }
   0x4   : > { %s4696_s18 = sadd.s32 1, %s4643_s15   ;;  %s91_s19 = sadd.s32 1, %s4639_s14 }
   0x5   : > { %s88_s20 = ssub.s32 %s4643_s15, %s4696_s18  ;;  %p101_p0 = scmp.ne.s32.totalorder %s4639_s14, %s4635_s13 }
   0x6   : > { %p89_p1 = scmp.eq.s32.totalorder %s88_s20, 0  ;;  %p102_p2 = scmp.eq.s32.totalorder %s4692_s16, 15 }
   0x7   : > { %p107_p3 = scmp.ne.s32.totalorder %s4635_s13, %s4631_s12  ;;  %p108_p4 = scmp.eq.s32.totalorder %s4185_s17, 15 }
   0x8   : > { %s4707_s21 = scalar_select %p89_p1, %s4639_s14, %s91_s19  }
   0x9   : > { %p4709_p5 = por %p102_p2, %p101_p0  ;;  %p4713_p6 = por %p108_p4, %p107_p3 }
   0xa   : > { %p4188_p7 = scmp.ge.s32.totalorder %s4643_s15, 1  ;;  %p140_p8 = scmp.lt.s32.totalorder %s4643_s15, 17 }
   0xc   : > { %p141_p9 = pnand %p4188_p7, %p140_p8 }
   0xe   : > { %144 = sbr.rel (%p141_p9) target bundleno = 543 (0x21f), region = 32 }
  0x13   : > { %v346_v0 = vlaneseq  ;;  %p164_p10 = scmp.lt.s32.totalorder %s4692_s16, 15  ;;  %v4645_v1 = vmov 1983009808   ;;  %vm432_vm0 = vcmask 1041408   ;;  %v6201_v3 = vmov 0   ;;  %v256_v5 = vld [vmem:[%s6196_s1] sm:$0xff] }
  0x14   : > { %v344_v2 = vunpack.c.l.s4 %v4645_v1  ;;  %492 = vmatprep.mubr.bf16.mxu0 %v6201_v3  ;;  %612 = vmatprep.mubr.bf16.mxu1 %v6201_v3  ;;  %v4208_v4 = vld.sshfl [vmem:[%s6196_s1 + $0x10] sm:$0x3 pattern:$0x76325410]  ;;  %v342_v8 = vcombine.high %v256_v5, %v256_v5  ;;  %v257_v10 = vld [vmem:[%s6196_s1 + $0x8] sm:$0xff]  ;;  %vm383_vm1 = vcmask 31744  }
  0x15   : > { %v4728_v6 = vshrl.u32 %v346_v0, 7  ;;  %s165_s28 = scalar_select %p164_p10, %s4692_s16, 15  ;;  %v4732_v7 = vsel %vm432_vm0, %v4208_v4, 0  ;;  %v359_v12 = vcombine.high %v257_v10, %v257_v10  ;;  %v4647_v38 = vmov 0.0  }
  0x16   : > { %v345_v9 = vunpack.c.0.s8 %v344_v2  ;;  %171 = vst [vmem:[#allocation2 + $0x730] sm:$0xff] %v4647_v38  ;;  %170 = vst [vmem:[#allocation2 + $0x3f0] sm:$0xff] %v4647_v38  ;;  %v4959_v47 = vrot.slane %v4647_v38, 7  ;;  %vm2420_vm2 = vcmask 1040384   ;;  %vm2712_vm9 = vcmask 1046528   ;;  %s161_s8 = sand.u32 1, %s4635_s13  }
  0x17   : > { %s4331_s29 = sshll.u32 %s165_s28, 7  ;;  %181 = vst [vmem:[#allocation2 + $0x228] sm:$0xff] %v4647_v38  ;;  %191 = vst [vmem:[#allocation2 + $0x708] sm:$0xff] %v4647_v38  ;;  %v1684_v42 = vadd.s32 16, %v4728_v6  ;;  %v1686_v44 = vadd.s32 32, %v4728_v6  ;;  %v1710_v45 = vadd.s32 224, %v4728_v6 }
  0x18   : > { %v348_v11 = vsub.s32 %v345_v9, %v4728_v6  ;;  %s4741_s7 = scalar_lea.vmem %s6195_s0, %s4331_s29  ;;  %202 = vst [vmem:[#allocation2 + $0x4a0] sm:$0xff] %v4647_v38  ;;  %212 = vst [vmem:[#allocation2 + $0x2e0] sm:$0xff] %v4647_v38  ;;  %v1688_v56 = vadd.s32 48, %v4728_v6  ;;  %v1712_v62 = vadd.s32 240, %v4728_v6  ;;  %s5880_s9 = sshll.u32 %s161_s8, 7 }
  0x19   : > { %v4745_v19 = vld [vmem:[%s4741_s7] sm:$0xff]   ;;  %v4763_v26 = vld [vmem:[%s4741_s7 + $0x8] sm:$0xff]   ;;  %v4777_v28 = vld [vmem:[%s4741_s7 + $0x10] sm:$0xff]   ;;  %223 = vst [vmem:[#allocation2 + $0x5a8] sm:$0xff] %v4647_v38  ;;  %v1732_v43 = vand.u32 15, %v1684_v42  ;;  %v1746_v50 = vand.u32 15, %v1686_v44 }
  0x1a   : > { %v349_v13 = vrot.slane %v256_v5, %v348_v11  ;;  %v356_v14 = vrot.slane %v342_v8, %v348_v11  ;;  %v366_v15 = vrot.slane %v257_v10, %v348_v11  ;;  %v373_v21 = vrot.slane %v359_v12, %v348_v11  ;;  %v4750_v22 = vld [vmem:[%s4741_s7 + $0x60] sm:$0xff]   ;;  %v4768_v27 = vld [vmem:[%s4741_s7 + $0x68] sm:$0xff]   ;;  %v4780_v29 = vld [vmem:[%s4741_s7 + $0x70] sm:$0xff]   ;;  %s5916_s17 = scalar_lea.vmem [#allocation3], %s5880_s9  ;;  %s4364_s19 = sshll.u32 %s4692_s16, 11 }
  0x1b   : > { %v4789_v30 = vld [vmem:[%s4741_s7 + $0x18] sm:$0xff]   ;;  %v4801_v32 = vld [vmem:[%s4741_s7 + $0x20] sm:$0xff]   ;;  %v4811_v34 = vld [vmem:[%s4741_s7 + $0x28] sm:$0xff]   ;;  %v4956_v46 = vadd.s32 4294967295, %v1732_v43  ;;  %v1914_v51 = vand.u32 15, %v1710_v45  ;;  %v4975_v60 = vadd.s32 4294967295, %v1746_v50  ;;  %s6146_s16 = scalar_lea.hbm %s6198_s3, %s4364_s19 }
  0x1c   : > { %v357_v16 = vcombine.high %v349_v13, %v349_v13  ;;  %v434_v17 = vsel %vm432_vm0, %v349_v13, 0  ;;  %v358_v18 = vcombine.high %v356_v14, %v356_v14  ;;  %v374_v20 = vcombine.high %v366_v15, %v366_v15  ;;  %v4792_v31 = vld [vmem:[%s4741_s7 + $0x78] sm:$0xff]   ;;  %v4820_v35 = vld [vmem:[%s4741_s7 + $0x30] sm:$0xff]   ;;  %v4838_v37 = vld [vmem:[%s4741_s7 + $0x40] sm:$0xff]   ;;  %s4123_s20 = sshll.u32 %s5916_s17, 4  ;;  %s6155_s26 = scalar_lea.sflag [#allocation4], %s161_s8  ;;  %s6148_s20 = int_to_ptr.vmem [resolvable:$true] %s4123_s20 }
  0x1d   : > { %v440_v23 = vsel %vm432_vm0, %v356_v14, 0  ;;  %v446_v24 = vsel %vm432_vm0, %v366_v15, 0  ;;  %v375_v25 = vcombine.high %v373_v21, %v373_v21  ;;  %v452_v33 = vsel %vm432_vm0, %v373_v21, 0  ;;  %v4829_v36 = vld [vmem:[%s4741_s7 + $0x38] sm:$0xff]   ;;  %v4854_v39 = vld [vmem:[%s4741_s7 + $0x48] sm:$0xff]   ;;  %v4863_v40 = vld [vmem:[%s4741_s7 + $0x50] sm:$0xff]  }
  0x1e   : > { %4209 = vmatprep.subr.msk.bf16.mxu0 %vm432_vm0, %v357_v16  ;;  %4511 = vmatprep.subr.msk.bf16.mxu1 %vm432_vm0, %v357_v16  ;;  %v4872_v41 = vld [vmem:[%s4741_s7 + $0x58] sm:$0xff]   ;;  %6260 = vst [vmem:[#allocation6_spill] sm:$0xff] %v4956_v46  ;;  %vm6208_vm3 = vcmp.ge.s32.totalorder %v4956_v46, 0  ;;  %6261 = vst [vmem:[#allocation7_spill] sm:$0xff] %v4975_v60  ;;  %v4977_v61 = vadd.s32 4294967295, %v1914_v51  ;;  %v1760_v9 = vand.u32 15, %v1688_v56 }
  0x1f   : > { %475 = vmatpush1.bf16.msra.mxu0 %v434_v17  ;;  %4512 = vmatpush1.bf16.msra.mxu1 %v434_v17  ;;  %v1928_v14 = vand.u32 15, %v1712_v62  ;;  %vm6206_vm4 = vcmp.ge.s32.totalorder %v4975_v60, 0  ;;  %v1690_v42 = vadd.s32 64, %v4728_v6  ;;  %s4583_s27 = scalar_lea.vmem %s6148_s20, 2048  ;;  %s4648_s28 = smov [#allocation3]  }
  0x20   : > { %4226 = vmatprep.subr.msk.bf16.mxu1 %vm432_vm0, %v358_v18  ;;  %4243 = vmatprep.subr.msk.bf16.mxu0 %vm432_vm0, %v374_v20  ;;  %6262 = vst [vmem:[#allocation8_spill] sm:$0xff] %v4977_v61  ;;  %vm6215_vm5 = vcmp.ge.s32.totalorder %v4977_v61, 0  ;;  %p4584_p11 = scmp.ne.s32.totalorder %s6148_s20, %s4583_s27  ;;  %s4587_s29 = sshll.u32 %s4648_s28, 4  ;;  %s4588_s29 = int_to_ptr.vmem [resolvable:$false] %s4587_s29 }
  0x21   : > { %s4589_s30 = scalar_lea.vmem %s4588_s29, 4096  ;;  %p4590_p0 = scmp.lt.s32.totalorder %s6148_s20, %s4588_s29 }
  0x22   : > { %4210 = vmatmul.mubr.msk.bf16.vlgmr.msra.gmra.mxu0 %vm383_vm1, %v4745_v19  ;;  %4222 = vmatmul.mubr.msk.bf16.vlgmr.msra.gmra.mxu1 %vm383_vm1, %v4750_v22  ;;  %p4585_p12 = pnand %p4584_p11, %p4709_p5  ;;  %p4591_p1 = scmp.lt.s32.totalorder %s4589_s30, %s4583_s27 }
  0x23   : > { %668 = vmatpush1.bf16.msra.mxu1 %v440_v23  ;;  %861 = vmatpush1.bf16.msra.mxu0 %v446_v24 }
  0x24   : > { %502 = vmatprep.mubr.bf16.mxu0 %v6201_v3  ;;  %622 = vmatprep.mubr.bf16.mxu1 %v6201_v3  ;;  %p4586_p13 = pneg %p4585_p12  ;;  %p4592_p2 = por %p4591_p1, %p4590_p0 }
  0x25   : > { %4260 = vmatprep.subr.msk.bf16.mxu1 %vm432_vm0, %v375_v25  ;;  %4513 = vmatprep.subr.msk.bf16.mxu0 %vm432_vm0, %v4208_v4 }
  0x26   : > { %p4593_p3 = pnand %p4592_p2, %p4586_p13 }
  0x2a   : > { %4211 = vmatmul.mubr.msk.bf16.gmra.mxu0 %vm383_vm1, %v4763_v26  ;;  %4223 = vmatmul.mubr.msk.bf16.gmra.mxu1 %vm383_vm1, %v4768_v27 }
  0x2b   : > { %512 = vmatprep.mubr.bf16.mxu0 %v6201_v3  ;;  %632 = vmatprep.mubr.bf16.mxu1 %v6201_v3 }
  0x32   : > { %4212 = vmatmul.mubr.msk.bf16.gmra.mxu0 %vm383_vm1, %v4777_v28  ;;  %4224 = vmatmul.mubr.msk.bf16.gmra.mxu1 %vm383_vm1, %v4780_v29 }
  0x33   : > { %522 = vmatprep.mubr.bf16.mxu0 %v6201_v3  ;;  %642 = vmatprep.mubr.bf16.mxu1 %v6201_v3 }
  0x3a   : > { %4213 = vmatmul.mubr.msk.bf16.gmra.mxu0 %vm383_vm1, %v4789_v30  ;;  %4225 = vmatmul.mubr.msk.bf16.gmra.mxu1 %vm383_vm1, %v4792_v31 }
  0x3b   : > { %532 = vmatprep.mubr.bf16.mxu0 %v6201_v3  ;;  %685 = vmatprep.mubr.bf16.mxu1 %v6201_v3 }
  0x42   : > { %4214 = vmatmul.mubr.msk.bf16.gmra.mxu0 %vm383_vm1, %v4801_v32  ;;  %4227 = vmatmul.mubr.msk.bf16.vlgmr.msra.gmra.mxu1 %vm383_vm1, %v4745_v19 }
  0x43   : > { %1054 = vmatpush1.bf16.msra.mxu1 %v452_v33  ;;  %542 = vmatprep.mubr.bf16.mxu0 %v6201_v3  ;;  %v5007_v33 = vadd.s32 4294967295, %v1928_v14 }
  0x44   : > { %695 = vmatprep.mubr.bf16.mxu1 %v6201_v3 }
  0x45   : > { %6265 = vst [vmem:[#allocation11_spill] sm:$0xff] %v5007_v33  ;;  %vm6213_vm7 = vcmp.ge.s32.totalorder %v5007_v33, 0 }
  0x4a   : > { %4215 = vmatmul.mubr.msk.bf16.gmra.mxu0 %vm383_vm1, %v4811_v34  ;;  %4228 = vmatmul.mubr.msk.bf16.gmra.mxu1 %vm383_vm1, %v4763_v26 }
  0x4b   : > { %552 = vmatprep.mubr.bf16.mxu0 %v6201_v3  ;;  %705 = vmatprep.mubr.bf16.mxu1 %v6201_v3 }
  0x52   : > { %4216 = vmatmul.mubr.msk.bf16.gmra.mxu0 %vm383_vm1, %v4820_v35  ;;  %4229 = vmatmul.mubr.msk.bf16.gmra.mxu1 %vm383_vm1, %v4777_v28 }
  0x53   : > { %562 = vmatprep.mubr.bf16.mxu0 %v6201_v3  ;;  %715 = vmatprep.mubr.bf16.mxu1 %v6201_v3 }
  0x5a   : > { %4217 = vmatmul.mubr.msk.bf16.gmra.mxu0 %vm383_vm1, %v4829_v36  ;;  %4230 = vmatmul.mubr.msk.bf16.gmra.mxu1 %vm383_vm1, %v4789_v30 }
  0x5b   : > { %572 = vmatprep.mubr.bf16.mxu0 %v6201_v3  ;;  %725 = vmatprep.mubr.bf16.mxu1 %v6201_v3 }
  0x62   : > { %4218 = vmatmul.mubr.msk.bf16.gmra.mxu0 %vm383_vm1, %v4838_v37  ;;  %4231 = vmatmul.mubr.msk.bf16.gmra.mxu1 %vm383_vm1, %v4801_v32 }
  0x63   : > { %582 = vmatprep.mubr.bf16.mxu0 %v6201_v3  ;;  %735 = vmatprep.mubr.bf16.mxu1 %v6201_v3 }
  0x6a   : > { %4219 = vmatmul.mubr.msk.bf16.gmra.mxu0 %vm383_vm1, %v4854_v39  ;;  %4232 = vmatmul.mubr.msk.bf16.gmra.mxu1 %vm383_vm1, %v4811_v34 }
  0x6b   : > { %592 = vmatprep.mubr.bf16.mxu0 %v6201_v3  ;;  %745 = vmatprep.mubr.bf16.mxu1 %v6201_v3 }
  0x72   : > { %4220 = vmatmul.mubr.msk.bf16.gmra.mxu0 %vm383_vm1, %v4863_v40  ;;  %4233 = vmatmul.mubr.msk.bf16.gmra.mxu1 %vm383_vm1, %v4820_v35 }
  0x73   : > { %602 = vmatprep.mubr.bf16.mxu0 %v6201_v3  ;;  %755 = vmatprep.mubr.bf16.mxu1 %v6201_v3 }
  0x7a   : > { %4221 = vmatmul.mubr.msk.bf16.gmra.mxu0 %vm383_vm1, %v4872_v41  ;;  %4234 = vmatmul.mubr.msk.bf16.gmra.mxu1 %vm383_vm1, %v4829_v36 }
  0x7b   : > { %765 = vmatprep.mubr.bf16.mxu1 %v6201_v3  ;;  %878 = vmatprep.mubr.bf16.mxu0 %v6201_v3 }
  0x82   : > { %4235 = vmatmul.mubr.msk.bf16.gmra.mxu1 %vm383_vm1, %v4838_v37  ;;  %4244 = vmatmul.mubr.msk.bf16.vlgmr.msra.gmra.mxu0 %vm383_vm1, %v4745_v19 }
  0x83   : > { %4478 = vmatpush3.bf16.msra.mxu0 %v4732_v7  ;;  %775 = vmatprep.mubr.bf16.mxu1 %v6201_v3 }
  0x84   : > { %888 = vmatprep.mubr.bf16.mxu0 %v6201_v3 }
  0x8a   : > { %4236 = vmatmul.mubr.msk.bf16.gmra.mxu1 %vm383_vm1, %v4854_v39  ;;  %4245 = vmatmul.mubr.msk.bf16.gmra.mxu0 %vm383_vm1, %v4763_v26 }
  0x8b   : > { %785 = vmatprep.mubr.bf16.mxu1 %v6201_v3  ;;  %898 = vmatprep.mubr.bf16.mxu0 %v6201_v3 }
  0x92   : > { %4237 = vmatmul.mubr.msk.bf16.gmra.mxu1 %vm383_vm1, %v4863_v40  ;;  %4246 = vmatmul.mubr.msk.bf16.gmra.mxu0 %vm383_vm1, %v4777_v28 }
  0x93   : > { %795 = vmatprep.mubr.bf16.mxu1 %v6201_v3  ;;  %908 = vmatprep.mubr.bf16.mxu0 %v6201_v3 }
  0x9a   : > { %4238 = vmatmul.mubr.msk.bf16.gmra.mxu1 %vm383_vm1, %v4872_v41  ;;  %4247 = vmatmul.mubr.msk.bf16.gmra.mxu0 %vm383_vm1, %v4789_v30 }
  0x9b   : > { %805 = vmatprep.mubr.bf16.mxu1 %v6201_v3  ;;  %918 = vmatprep.mubr.bf16.mxu0 %v6201_v3 }
  0xa2   : > { %4239 = vmatmul.mubr.msk.bf16.gmra.mxu1 %vm383_vm1, %v4750_v22  ;;  %4248 = vmatmul.mubr.msk.bf16.gmra.mxu0 %vm383_vm1, %v4801_v32 }
  0xa3   : > { %815 = vmatprep.mubr.bf16.mxu1 %v6201_v3  ;;  %928 = vmatprep.mubr.bf16.mxu0 %v6201_v3 }
  0xaa   : > { %4240 = vmatmul.mubr.msk.bf16.gmra.mxu1 %vm383_vm1, %v4768_v27  ;;  %4249 = vmatmul.mubr.msk.bf16.gmra.mxu0 %vm383_vm1, %v4811_v34 }
  0xab   : > { %825 = vmatprep.mubr.bf16.mxu1 %v6201_v3  ;;  %938 = vmatprep.mubr.bf16.mxu0 %v6201_v3 }
  0xb2   : > { %4241 = vmatmul.mubr.msk.bf16.gmra.mxu1 %vm383_vm1, %v4780_v29  ;;  %4250 = vmatmul.mubr.msk.bf16.gmra.mxu0 %vm383_vm1, %v4820_v35 }
  0xb3   : > { %835 = vmatprep.mubr.bf16.mxu1 %v6201_v3  ;;  %948 = vmatprep.mubr.bf16.mxu0 %v6201_v3 }
  0xba   : > { %4242 = vmatmul.mubr.msk.bf16.gmra.mxu1 %vm383_vm1, %v4792_v31  ;;  %4251 = vmatmul.mubr.msk.bf16.gmra.mxu0 %vm383_vm1, %v4829_v36 }
  0xbb   : > { %958 = vmatprep.mubr.bf16.mxu0 %v6201_v3  ;;  %1071 = vmatprep.mubr.bf16.mxu1 %v6201_v3 }
  0xc2   : > { %4252 = vmatmul.mubr.msk.bf16.gmra.mxu0 %vm383_vm1, %v4838_v37  ;;  %4261 = vmatmul.mubr.msk.bf16.vlgmr.msra.gmra.mxu1 %vm383_vm1, %v4745_v19 }
  0xc3   : > { %968 = vmatprep.mubr.bf16.mxu0 %v6201_v3  ;;  %1081 = vmatprep.mubr.bf16.mxu1 %v6201_v3 }
  0xca   : > { %4253 = vmatmul.mubr.msk.bf16.gmra.mxu0 %vm383_vm1, %v4854_v39  ;;  %4262 = vmatmul.mubr.msk.bf16.gmra.mxu1 %vm383_vm1, %v4763_v26 }
  0xcb   : > { %978 = vmatprep.mubr.bf16.mxu0 %v6201_v3  ;;  %1091 = vmatprep.mubr.bf16.mxu1 %v6201_v3 }
  0xd2   : > { %4254 = vmatmul.mubr.msk.bf16.gmra.mxu0 %vm383_vm1, %v4863_v40  ;;  %4263 = vmatmul.mubr.msk.bf16.gmra.mxu1 %vm383_vm1, %v4777_v28 }
  0xd3   : > { %988 = vmatprep.mubr.bf16.mxu0 %v6201_v3  ;;  %1101 = vmatprep.mubr.bf16.mxu1 %v6201_v3 }
  0xda   : > { %4255 = vmatmul.mubr.msk.bf16.gmra.mxu0 %vm383_vm1, %v4872_v41  ;;  %4264 = vmatmul.mubr.msk.bf16.gmra.mxu1 %vm383_vm1, %v4789_v30 }
  0xdb   : > { %998 = vmatprep.mubr.bf16.mxu0 %v6201_v3  ;;  %1111 = vmatprep.mubr.bf16.mxu1 %v6201_v3 }
  0xe2   : > { %v494_v48 = vpop.f32.mrf.mxu0  ;;  %v4961_v49 = vpop.f32.mrf.mxu1  ;;  %4256 = vmatmul.mubr.msk.bf16.gmra.mxu0 %vm383_vm1, %v4750_v22  ;;  %4265 = vmatmul.mubr.msk.bf16.gmra.mxu1 %vm383_vm1, %v4801_v32  ;;  %v5001_v22 = vadd.s32 4294967295, %v1760_v9 }
  0xe3   : > { %v2426_v52 = vrot.slane %v494_v48, 7  ;;  %1008 = vmatprep.mubr.bf16.mxu0 %v6201_v3  ;;  %1121 = vmatprep.mubr.bf16.mxu1 %v6201_v3  ;;  %v6199_v63 = vrot.slane %v4961_v49, 7 }
  0xe4   : > { %v496_v53 = vpop.f32.mrf.mxu0  ;;  %v616_v54 = vpop.f32.mrf.mxu1  ;;  %6264 = vst [vmem:[#allocation10_spill] sm:$0xff] %v5001_v22  ;;  %vm6209_vm6 = vcmp.ge.s32.totalorder %v5001_v22, 0 }
  0xe5   : > { %v2427_v55 = vsel %vm2420_vm2, %v4959_v47, %v2426_v52  ;;  %1610 = vst [vmem:[#allocation2 + $0x1f0] sm:$0xff] %v616_v54 }
  0xe6   : > { %v2520_v57 = vsel %vm6208_vm3, %v2427_v55, 0.0  ;;  %v498_v58 = vpop.f32.mrf.mxu0  ;;  %v618_v59 = vpop.f32.mrf.mxu1 }
  0xe7   : > { %v4981_v0 = vadd.f32 %v2520_v57, %v496_v53  ;;  %v2428_v1 = vrot.slane %v498_v58, 7  ;;  %v2476_v2 = vrot.slane %v618_v59, 7  ;;  %v1774_v58 = vand.u32 15, %v1690_v42 }
  0xe8   : > { %v500_v4 = vpop.f32.mrf.mxu0  ;;  %v620_v5 = vpop.f32.mrf.mxu1 }
  0xe9   : > { %v2429_v7 = vsel %vm2420_vm2, %v2426_v52, %v2428_v1  ;;  %v2477_v8 = vsel %vm2420_vm2, %v6199_v63, %v2476_v2 }
  0xea   : > { %v4987_v10 = vadd.f32 %v2429_v7, %v500_v4  ;;  %v4989_v11 = vadd.f32 %v2477_v8, %v620_v5  ;;  %v504_v12 = vpop.f32.mrf.mxu0  ;;  %v624_v13 = vpop.f32.mrf.mxu1  ;;  %4257 = vmatmul.mubr.msk.bf16.gmra.mxu0 %vm383_vm1, %v4768_v27  ;;  %4266 = vmatmul.mubr.msk.bf16.gmra.mxu1 %vm383_vm1, %v4811_v34 }
  0xeb   : > { %v2430_v15 = vrot.slane %v504_v12, 7  ;;  %v2478_v16 = vrot.slane %v624_v13, 7  ;;  %1018 = vmatprep.mubr.bf16.mxu0 %v6201_v3  ;;  %1131 = vmatprep.mubr.bf16.mxu1 %v6201_v3  ;;  %v5034_v12 = vadd.s32 4294967295, %v1774_v58  ;;  %v1694_v58 = vadd.s32 96, %v4728_v6 }
  0xec   : > { %6263 = vst [vmem:[#allocation9_spill] sm:$0xff] %v4989_v11  ;;  %v506_v17 = vpop.f32.mrf.mxu0  ;;  %v626_v18 = vpop.f32.mrf.mxu1 }
  0xed   : > { %v2431_v20 = vsel %vm2420_vm2, %v2428_v1, %v2430_v15  ;;  %v2479_v21 = vsel %vm2420_vm2, %v2476_v2, %v2478_v16  ;;  %6268 = vst [vmem:[#allocation14_spill] sm:$0xff] %v5034_v12  ;;  %vm6214_vm8 = vcmp.ge.s32.totalorder %v5034_v12, 0  ;;  %v2874_v12 = vld [vmem:[#allocation2 + $0x708] sm:$0x80] }
  0xee   : > { %v2522_v23 = vsel %vm6206_vm4, %v2431_v20, 0.0  ;;  %v2546_v24 = vsel %vm6215_vm5, %v2479_v21, 0.0  ;;  %v508_v25 = vpop.f32.mrf.mxu0  ;;  %v628_v27 = vpop.f32.mrf.mxu1  ;;  %v1683_v20 = vadd.s32 8, %v4728_v6 }
  0xef   : > { %v5010_v43 = vadd.f32 %v2522_v23, %v506_v17  ;;  %v5012_v44 = vadd.f32 %v2546_v24, %v626_v18  ;;  %v2432_v45 = vrot.slane %v508_v25, 7  ;;  %v2480_v48 = vrot.slane %v628_v27, 7 }
  0xf0   : > { %v510_v50 = vpop.f32.mrf.mxu0  ;;  %v630_v51 = vpop.f32.mrf.mxu1 }
  0xf1   : > { %6266 = vst [vmem:[#allocation12_spill] sm:$0xff] %v5012_v44  ;;  %v2433_v52 = vsel %vm2420_vm2, %v2430_v15, %v2432_v45  ;;  %v2481_v53 = vsel %vm2420_vm2, %v2478_v16, %v2480_v48  ;;  %v1692_v16 = vadd.s32 80, %v4728_v6 }
  0xf2   : > { %v5016_v54 = vadd.f32 %v2433_v52, %v510_v50  ;;  %v5018_v55 = vadd.f32 %v2481_v53, %v630_v51  ;;  %v514_v56 = vpop.f32.mrf.mxu0  ;;  %v634_v57 = vpop.f32.mrf.mxu1  ;;  %4258 = vmatmul.mubr.msk.bf16.gmra.mxu0 %vm383_vm1, %v4780_v29  ;;  %4267 = vmatmul.mubr.msk.bf16.gmra.mxu1 %vm383_vm1, %v4820_v35  ;;  %v1725_v50 = vand.u32 15, %v1683_v20  ;;  %v1685_v51 = vadd.s32 24, %v4728_v6 }
  0xf3   : > { %v2434_v59 = vrot.slane %v514_v56, 7  ;;  %v2482_v62 = vrot.slane %v634_v57, 7  ;;  %1028 = vmatprep.mubr.bf16.mxu0 %v6201_v3  ;;  %1141 = vmatprep.mubr.bf16.mxu1 %v6201_v3  ;;  %v1788_v42 = vand.u32 15, %v1692_v16 }
  0xf4   : > { %6267 = vst [vmem:[#allocation13_spill] sm:$0xff] %v5018_v55  ;;  %v516_v1 = vpop.f32.mrf.mxu0  ;;  %v636_v2 = vpop.f32.mrf.mxu1 }
  0xf5   : > { %v2435_v4 = vsel %vm2420_vm2, %v2432_v45, %v2434_v59  ;;  %v2483_v29 = vsel %vm2420_vm2, %v2480_v48, %v2482_v62 }
  0xf6   : > { %v2524_v5 = vsel %vm6209_vm6, %v2435_v4, 0.0  ;;  %v2548_v7 = vsel %vm6213_vm7, %v2483_v29, 0.0  ;;  %v518_v8 = vpop.f32.mrf.mxu0  ;;  %v638_v9 = vpop.f32.mrf.mxu1 }
  0xf7   : > { %v5036_v13 = vadd.f32 %v2524_v5, %v516_v1  ;;  %v5038_v14 = vadd.f32 %v2548_v7, %v636_v2  ;;  %v2436_v15 = vrot.slane %v518_v8, 7  ;;  %1654 = vst [vmem:[#allocation2 + $0x430] sm:$0xff] %v638_v9  ;;  %v5060_v2 = vadd.s32 4294967295, %v1788_v42 }
  0xf8   : > { %v520_v17 = vpop.f32.mrf.mxu0  ;;  %v640_v18 = vpop.f32.mrf.mxu1  ;;  %v5062_v5 = vadd.s32 1, %v1725_v50  ;;  %v1739_v7 = vand.u32 15, %v1685_v51  ;;  %v1687_v42 = vadd.s32 40, %v4728_v6 }
  0xf9   : > { %6269 = vst [vmem:[#allocation15_spill] sm:$0xff] %v5038_v14  ;;  %v2437_v21 = vsel %vm2420_vm2, %v2434_v59, %v2436_v15  ;;  %6270 = vst [vmem:[#allocation16_spill] sm:$0xff] %v5060_v2  ;;  %vm6220_vm10 = vcmp.ge.s32.totalorder %v5060_v2, 0 }
  0xfa   : > { %v5043_v23 = vadd.f32 %v2437_v21, %v520_v17  ;;  %v524_v24 = vpop.f32.mrf.mxu0  ;;  %v644_v25 = vpop.f32.mrf.mxu1  ;;  %4259 = vmatmul.mubr.msk.bf16.gmra.mxu0 %vm383_vm1, %v4792_v31  ;;  %4268 = vmatmul.mubr.msk.bf16.gmra.mxu1 %vm383_vm1, %v4829_v36  ;;  %6271 = vst [vmem:[#allocation17_spill] sm:$0xff] %v5062_v5  ;;  %vm2291_vm11 = vcmp.lt.s32.totalorder %v5062_v5, 16 }
  0xfb   : > { %v2438_v27 = vrot.slane %v524_v24, 7  ;;  %1151 = vmatprep.mubr.bf16.mxu1 %v6201_v3  ;;  %4479 = vmatprep.mubr.msk.bf16.mxu0 %vm383_vm1, %v4745_v19  ;;  %v1802_v24 = vand.u32 15, %v1694_v58 }
  0xfc   : > { %v526_v45 = vpop.f32.mrf.mxu0  ;;  %v646_v48 = vpop.f32.mrf.mxu1 }
  0xfd   : > { %v2439_v52 = vsel %vm2420_vm2, %v2436_v15, %v2438_v27  ;;  %v5067_v15 = vrot.slane %v4647_v38, 1  ;;  %v2425_v38 = vsel %vm2420_vm2, %v4959_v47, %v4959_v47 }
  0xfe   : > { %v2386_v31 = vld [vmem:[#allocation2 + $0x430] sm:$0x7f]  ;;  %v2526_v53 = vsel %vm6214_vm8, %v2439_v52, 0.0  ;;  %v528_v56 = vpop.f32.mrf.mxu0  ;;  %v648_v57 = vpop.f32.mrf.mxu1  ;;  %v5095_v52 = vadd.s32 4294967295, %v1802_v24 }
  0xff   : > { %v2484_v59 = vrot.slane %v2386_v31, 7  ;;  %v5058_v1 = vadd.f32 %v2526_v53, %v526_v45  ;;  %v2440_v19 = vrot.slane %v528_v56, 7  ;;  %v1696_v31 = vadd.s32 112, %v4728_v6 }
 0x100   : > { %v530_v4 = vpop.f32.mrf.mxu0  ;;  %v650_v29 = vpop.f32.mrf.mxu1  ;;  %6274 = vst [vmem:[#allocation20_spill] sm:$0xff] %v5095_v52  ;;  %vm6225_vm13 = vcmp.ge.s32.totalorder %v5095_v52, 0 }
 0x101   : > { %v2485_v8 = vsel %vm2420_vm2, %v2482_v62, %v2484_v59  ;;  %v2441_v9 = vsel %vm2420_vm2, %v2438_v27, %v2440_v19 }
 0x102   : > { %v5069_v16 = vadd.f32 %v2485_v8, %v640_v18  ;;  %v5071_v17 = vadd.f32 %v2441_v9, %v530_v4  ;;  %v534_v20 = vpop.f32.mrf.mxu0  ;;  %v687_v21 = vpop.f32.mrf.mxu1  ;;  %4269 = vmatmul.mubr.msk.bf16.gmra.mxu1 %vm383_vm1, %v4838_v37  ;;  %4480 = vmatmul.mubr.msk.bf16.vlgmr.msra.gmra.mxu0 %vm383_vm1, %v4763_v26  ;;  %v5087_v26 = vadd.s32 1, %v1739_v7 }
 0x103   : > { %v2442_v62 = vrot.slane %v534_v20, 7  ;;  %v2716_v25 = vrot.slane %v687_v21, 1  ;;  %1161 = vmatprep.mubr.bf16.mxu1 %v6201_v3  ;;  %4483 = vmatprep.mubr.msk.bf16.mxu0 %vm383_vm1, %v4777_v28 }
 0x104   : > { %6272 = vst [vmem:[#allocation18_spill] sm:$0xff] %v5069_v16  ;;  %v536_v18 = vpop.f32.mrf.mxu0  ;;  %v5085_v27 = vpop.f32.mrf.mxu1  ;;  %6273 = vst [vmem:[#allocation19_spill] sm:$0xff] %v5087_v26  ;;  %vm6236_vm12 = vcmp.lt.s32.totalorder %v5087_v26, 16 }
 0x105   : > { %v2717_v45 = vsel %vm2712_vm9, %v5067_v15, %v2716_v25  ;;  %v2443_v48 = vsel %vm2420_vm2, %v2440_v19, %v2442_v62  ;;  %v1753_v19 = vand.u32 15, %v1687_v42  ;;  %v6200_v29 = vrot.slane %v5085_v27, 7 }
 0x106   : > { %v2528_v28 = vsel %vm6220_vm10, %v2443_v48, 0.0  ;;  %v538_v50 = vpop.f32.mrf.mxu0  ;;  %v691_v51 = vpop.f32.mrf.mxu1  ;;  %v2811_v53 = vsel %vm2291_vm11, %v2717_v45, 0.0 }
 0x107   : > { %v5100_v56 = vadd.f32 %v2528_v28, %v536_v18  ;;  %v2444_v57 = vrot.slane %v538_v50, 7  ;;  %v2718_v58 = vrot.slane %v691_v51, 1  ;;  %v1816_v18 = vand.u32 15, %v1696_v31 }
 0x108   : > { %v540_v59 = vpop.f32.mrf.mxu0  ;;  %v693_v4 = vpop.f32.mrf.mxu1  ;;  %v2843_v45 = vadd.f32 %v2811_v53, %v2425_v38  ;;  %v5125_v53 = vadd.s32 1, %v1753_v19 }
 0x109   : > { %v2719_v7 = vsel %vm2712_vm9, %v2716_v25, %v2718_v58  ;;  %v2445_v8 = vsel %vm2420_vm2, %v2442_v62, %v2444_v57  ;;  %v2943_v9 = vrot.slane %v693_v4, 7 }
 0x10a   : > { %v5106_v20 = vadd.f32 %v2445_v8, %v540_v59  ;;  %v544_v21 = vpop.f32.mrf.mxu0  ;;  %v697_v24 = vpop.f32.mrf.mxu1  ;;  %4270 = vmatmul.mubr.msk.bf16.gmra.mxu1 %vm383_vm1, %v4854_v39  ;;  %4484 = vmatmul.mubr.msk.bf16.gmra.mxu0 %vm383_vm1, %v4789_v30  ;;  %v2844_v42 = vadd.f32 %v2719_v7, %v4981_v0  ;;  %v1689_v30 = vadd.s32 56, %v4728_v6  ;;  %6275 = vst [vmem:[#allocation21_spill] sm:$0xff] %v5125_v53  ;;  %v5131_v8 = vadd.s32 4294967295, %v1816_v18 }
 0x10b   : > { %v2446_v48 = vrot.slane %v544_v21, 7  ;;  %v2720_v28 = vrot.slane %v697_v24, 1  ;;  %1171 = vmatprep.mubr.bf16.mxu1 %v6201_v3  ;;  %4487 = vmatprep.mubr.msk.bf16.mxu0 %vm383_vm1, %v4801_v32  ;;  %v2944_v62 = vsel %vm2420_vm2, %v6200_v29, %v2943_v9  ;;  %v1698_v21 = vadd.s32 128, %v4728_v6 }
 0x10c   : > { %v546_v25 = vpop.f32.mrf.mxu0  ;;  %v699_v50 = vpop.f32.mrf.mxu1  ;;  %v5121_v38 = vadd.f32 %v2944_v62, %v2843_v45  ;;  %6276 = vst [vmem:[#allocation22_spill] sm:$0xff] %v5131_v8  ;;  %vm2295_vm14 = vcmp.lt.s32.totalorder %v5125_v53, 16  ;;  %vm6226_vm15 = vcmp.ge.s32.totalorder %v5131_v8, 0 }
 0x10d   : > { %v2721_v0 = vsel %vm2712_vm9, %v2718_v58, %v2720_v28  ;;  %v2447_v51 = vsel %vm2420_vm2, %v2444_v57, %v2446_v48  ;;  %v2945_v31 = vrot.slane %v699_v50, 7  ;;  %v1767_v50 = vand.u32 15, %v1689_v30 }
 0x10e   : > { %v2813_v32 = vsel %vm6236_vm12, %v2721_v0, 0.0  ;;  %v2530_v59 = vsel %vm6225_vm13, %v2447_v51, 0.0  ;;  %v548_v4 = vpop.f32.mrf.mxu0  ;;  %v701_v7 = vpop.f32.mrf.mxu1 }
 0x10f   : > { %v5134_v24 = vadd.f32 %v2530_v59, %v546_v25  ;;  %v2946_v58 = vsel %vm2420_vm2, %v2943_v9, %v2945_v31  ;;  %v2448_v57 = vrot.slane %v548_v4, 7  ;;  %v2722_v45 = vrot.slane %v701_v7, 1 }
 0x110   : > { %v550_v19 = vpop.f32.mrf.mxu0  ;;  %v703_v62 = vpop.f32.mrf.mxu1  ;;  %v3039_v0 = vsel %vm6208_vm3, %v2946_v58, 0.0  ;;  %v2845_v51 = vadd.f32 %v2813_v32, %v4987_v10  ;;  %v1830_v10 = vand.u32 15, %v1698_v21  ;;  %v1691_v58 = vadd.s32 72, %v4728_v6 }
 0x111   : > { %v2723_v63 = vsel %vm2712_vm9, %v2720_v28, %v2722_v45  ;;  %v2449_v18 = vsel %vm2420_vm2, %v2446_v48, %v2448_v57  ;;  %v2947_v29 = vrot.slane %v703_v62, 7  ;;  %v5142_v3 = vadd.f32 %v3039_v0, %v2844_v42 }
 0x112   : > { %v5144_v25 = vadd.f32 %v2449_v18, %v550_v19  ;;  %v554_v9 = vpop.f32.mrf.mxu0  ;;  %v707_v59 = vpop.f32.mrf.mxu1  ;;  %4271 = vmatmul.mubr.msk.bf16.gmra.mxu1 %vm383_vm1, %v4863_v40  ;;  %4488 = vmatmul.mubr.msk.bf16.gmra.mxu0 %vm383_vm1, %v4811_v34  ;;  %v2846_v28 = vadd.f32 %v2723_v63, %v5010_v43  ;;  %v6277_v42 = vmov 0   ;;  %v5162_v21 = vadd.s32 1, %v1767_v50 }
 0x113   : > { %v2450_v30 = vrot.slane %v554_v9, 7  ;;  %v2724_v48 = vrot.slane %v707_v59, 1  ;;  %1181 = vmatprep.mubr.bf16.mxu1 %v6277_v42  ;;  %4491 = vmatprep.mubr.msk.bf16.mxu0 %vm383_vm1, %v4820_v35  ;;  %v2948_v32 = vsel %vm2420_vm2, %v2945_v31, %v2947_v29  ;;  %v5168_v18 = vadd.s32 4294967295, %v1830_v10 }
 0x114   : > { %v556_v4 = vpop.f32.mrf.mxu0  ;;  %v709_v7 = vpop.f32.mrf.mxu1  ;;  %v5158_v19 = vadd.f32 %v2948_v32, %v2845_v51  ;;  %6278 = vst [vmem:[#allocation23_spill] sm:$0xff] %v5162_v21  ;;  %v1700_v51 = vadd.s32 144, %v4728_v6  ;;  %vm6248_vm0 = vcmp.lt.s32.totalorder %v5162_v21, 16 }
 0x115   : > { %v2725_v34 = vsel %vm2712_vm9, %v2722_v45, %v2724_v48  ;;  %v2451_v63 = vsel %vm2420_vm2, %v2448_v57, %v2450_v30  ;;  %v2949_v43 = vrot.slane %v709_v7, 7  ;;  %6279 = vst [vmem:[#allocation24_spill] sm:$0xff] %v5168_v18  ;;  %v1781_v7 = vand.u32 15, %v1691_v58 }
 0x116   : > { %v2815_v62 = vsel %vm2295_vm14, %v2725_v34, 0.0  ;;  %v2532_v35 = vsel %vm6226_vm15, %v2451_v63, 0.0  ;;  %v558_v31 = vpop.f32.mrf.mxu0  ;;  %v711_v0 = vpop.f32.mrf.mxu1 }
 0x117   : > { %v5171_v9 = vadd.f32 %v2532_v35, %v556_v4  ;;  %v2950_v45 = vsel %vm2420_vm2, %v2947_v29, %v2949_v43  ;;  %v2452_v57 = vrot.slane %v558_v31, 7  ;;  %v2726_v59 = vrot.slane %v711_v0, 1 }
 0x118   : > { %v560_v50 = vpop.f32.mrf.mxu0  ;;  %v713_v32 = vpop.f32.mrf.mxu1  ;;  %v3041_v34 = vsel %vm6206_vm4, %v2950_v45, 0.0  ;;  %v2847_v63 = vadd.f32 %v2815_v62, %v5016_v54  ;;  %v1844_v54 = vand.u32 15, %v1700_v51  ;;  %vm6228_vm4 = vcmp.ge.s32.totalorder %v5168_v18, 0 }
 0x119   : > { %v2727_v46 = vsel %vm2712_vm9, %v2724_v48, %v2726_v59  ;;  %v2453_v10 = vsel %vm2420_vm2, %v2450_v30, %v2452_v57  ;;  %v2951_v16 = vrot.slane %v713_v32, 7  ;;  %v5179_v33 = vadd.f32 %v3041_v34, %v2846_v28 }
 0x11a   : > { %v5181_v4 = vadd.f32 %v2453_v10, %v560_v50  ;;  %v564_v29 = vpop.f32.mrf.mxu0  ;;  %v717_v35 = vpop.f32.mrf.mxu1  ;;  %4272 = vmatmul.mubr.msk.bf16.gmra.mxu1 %vm383_vm1, %v4872_v41  ;;  %4492 = vmatmul.mubr.msk.bf16.gmra.mxu0 %vm383_vm1, %v4829_v36  ;;  %v2848_v48 = vadd.f32 %v2727_v46, %v5036_v13  ;;  %v1693_v0 = vadd.s32 88, %v4728_v6  ;;  %v5199_v51 = vadd.s32 1, %v1781_v7 }
 0x11b   : > { %v2454_v58 = vrot.slane %v564_v29, 7  ;;  %v2728_v30 = vrot.slane %v717_v35, 1  ;;  %1191 = vmatprep.mubr.bf16.mxu1 %v6277_v42  ;;  %4495 = vmatprep.mubr.msk.bf16.mxu0 %vm383_vm1, %v4838_v37  ;;  %v2952_v28 = vsel %vm2420_vm2, %v2949_v43, %v2951_v16  ;;  %v5205_v34 = vadd.s32 4294967295, %v1844_v54 }
 0x11c   : > { %v566_v62 = vpop.f32.mrf.mxu0  ;;  %v719_v31 = vpop.f32.mrf.mxu1  ;;  %v5195_v45 = vadd.f32 %v2952_v28, %v2847_v63  ;;  %6280 = vst [vmem:[#allocation25_spill] sm:$0xff] %v5199_v51  ;;  %v1702_v63 = vadd.s32 160, %v4728_v6  ;;  %v1795_v28 = vand.u32 15, %v1693_v0  ;;  %vm6244_vm3 = vcmp.lt.s32.totalorder %v5199_v51, 16  ;;  %v4576_v0 = vld [vmem:[%s4741_s7 + $0x60] sm:$0xff]  }
 0x11d   : > { %v2729_v36 = vsel %vm2712_vm9, %v2726_v59, %v2728_v30  ;;  %v2455_v46 = vsel %vm2420_vm2, %v2452_v57, %v2454_v58  ;;  %v2953_v13 = vrot.slane %v719_v31, 7  ;;  %6281 = vst [vmem:[#allocation26_spill] sm:$0xff] %v5205_v34  ;;  %v1718_v31 = vand.u32 15, %v4728_v6 }
 0x11e   : > { %v2817_v50 = vsel %vm6248_vm0, %v2729_v36, 0.0  ;;  %v2534_v37 = vsel %vm6228_vm4, %v2455_v46, 0.0  ;;  %v568_v43 = vpop.f32.mrf.mxu0  ;;  %v721_v32 = vpop.f32.mrf.mxu1 }
 0x11f   : > { %v5208_v10 = vadd.f32 %v2534_v37, %v566_v62  ;;  %v2954_v59 = vsel %vm2420_vm2, %v2951_v16, %v2953_v13  ;;  %v2456_v57 = vrot.slane %v568_v43, 7  ;;  %v2730_v7 = vrot.slane %v721_v32, 1 }
 0x120   : > { %v570_v29 = vpop.f32.mrf.mxu0  ;;  %v723_v35 = vpop.f32.mrf.mxu1  ;;  %v3043_v36 = vsel %vm6209_vm6, %v2954_v59, 0.0  ;;  %v2849_v54 = vadd.f32 %v2817_v50, %v5043_v23  ;;  %v1858_v23 = vand.u32 15, %v1702_v63  ;;  %vm6234_vm6 = vcmp.ge.s32.totalorder %v5205_v34, 0 }
 0x121   : > { %v2731_v46 = vsel %vm2712_vm9, %v2728_v30, %v2730_v7  ;;  %v2457_v62 = vsel %vm2420_vm2, %v2454_v58, %v2456_v57  ;;  %v2955_v37 = vrot.slane %v723_v35, 7  ;;  %v5217_v60 = vadd.f32 %v3043_v36, %v2848_v48 }
 0x122   : > { %v5219_v16 = vadd.f32 %v2457_v62, %v570_v29  ;;  %v574_v43 = vpop.f32.mrf.mxu0  ;;  %v727_v32 = vpop.f32.mrf.mxu1  ;;  %4273 = vmatmul.mubr.msk.bf16.gmra.mxu1 %vm383_vm1, %v4576_v0  ;;  %4496 = vmatmul.mubr.msk.bf16.gmra.mxu0 %vm383_vm1, %v4854_v39  ;;  %v2850_v30 = vadd.f32 %v2731_v46, %v5058_v1  ;;  %v1695_v35 = vadd.s32 104, %v4728_v6  ;;  %v5233_v36 = vadd.s32 4294967295, %v1718_v31 }
 0x123   : > { %v2458_v50 = vrot.slane %v574_v43, 7  ;;  %v2732_v58 = vrot.slane %v727_v32, 1  ;;  %1201 = vmatprep.mubr.bf16.mxu1 %v6277_v42  ;;  %4499 = vmatprep.mubr.msk.bf16.mxu0 %vm383_vm1, %v4863_v40  ;;  %v2956_v48 = vsel %vm2420_vm2, %v2953_v13, %v2955_v37  ;;  %v5239_v62 = vadd.s32 1, %v1795_v28  ;;  %v2354_v43 = vld [vmem:[#allocation2 + $0x3f0] sm:$0x80] }
 0x124   : > { %v576_v59 = vpop.f32.mrf.mxu0  ;;  %v729_v29 = vpop.f32.mrf.mxu1  ;;  %v5235_v39 = vadd.f32 %v2956_v48, %v2849_v54  ;;  %v5245_v31 = vadd.s32 4294967295, %v1858_v23  ;;  %v1704_v54 = vadd.s32 176, %v4728_v6  ;;  %v1809_v55 = vand.u32 15, %v1695_v35  ;;  %v4577_v35 = vld [vmem:[%s4741_s7 + $0x68] sm:$0xff]  }
 0x125   : > { %v2733_v1 = vsel %vm2712_vm9, %v2730_v7, %v2732_v58  ;;  %v2459_v63 = vsel %vm2420_vm2, %v2456_v57, %v2458_v50  ;;  %v2957_v46 = vrot.slane %v729_v29, 7  ;;  %6282 = vst [vmem:[#allocation27_spill] sm:$0xff] %v5239_v62  ;;  %vm6219_vm7 = vcmp.lt.s32.totalorder %v5239_v62, 16 }
 0x126   : > { %v2819_v40 = vsel %vm6244_vm3, %v2733_v1, 0.0  ;;  %v2536_v13 = vsel %vm6234_vm6, %v2459_v63, 0.0  ;;  %v578_v32 = vpop.f32.mrf.mxu0  ;;  %v731_v22 = vpop.f32.mrf.mxu1  ;;  %6283 = vst [vmem:[#allocation28_spill] sm:$0xff] %v5245_v31  ;;  %v2421_v1 = vrot.slane %v2354_v43, 7  ;;  %vm2130_vm5 = vcmp.ge.s32.totalorder %v5233_v36, 0 }
 0x127   : > { %v5248_v48 = vadd.f32 %v2536_v13, %v576_v59  ;;  %v2958_v57 = vsel %vm2420_vm2, %v2955_v37, %v2957_v46  ;;  %v2460_v7 = vrot.slane %v578_v32, 7  ;;  %v2734_v28 = vrot.slane %v731_v22, 1 }
 0x128   : > { %v580_v29 = vpop.f32.mrf.mxu0  ;;  %v733_v14 = vpop.f32.mrf.mxu1  ;;  %v3045_v63 = vsel %vm6214_vm8, %v2958_v57, 0.0  ;;  %v2851_v61 = vadd.f32 %v2819_v40, %v5071_v17  ;;  %v1872_v17 = vand.u32 15, %v1704_v54  ;;  %vm6235_vm8 = vcmp.ge.s32.totalorder %v5245_v31, 0 }
 0x129   : > { %v2735_v23 = vsel %vm2712_vm9, %v2732_v58, %v2734_v28  ;;  %v2461_v44 = vsel %vm2420_vm2, %v2458_v50, %v2460_v7  ;;  %v2959_v59 = vrot.slane %v733_v14, 7  ;;  %v5256_v13 = vadd.f32 %v3045_v63, %v2850_v30 }
 0x12a   : > { %v5258_v37 = vadd.f32 %v2461_v44, %v580_v29  ;;  %v584_v32 = vpop.f32.mrf.mxu0  ;;  %v737_v22 = vpop.f32.mrf.mxu1  ;;  %4274 = vmatmul.mubr.msk.bf16.gmra.mxu1 %vm383_vm1, %v4577_v35  ;;  %4500 = vmatmul.mubr.msk.bf16.gmra.mxu0 %vm383_vm1, %v4872_v41  ;;  %v2852_v58 = vadd.f32 %v2735_v23, %v5100_v56  ;;  %v1697_v40 = vadd.s32 120, %v4728_v6  ;;  %v2423_v41 = vsel %vm2420_vm2, %v2421_v1, %v4959_v47 }
 0x12b   : > { %v2462_v43 = vrot.slane %v584_v32, 7  ;;  %v2736_v50 = vrot.slane %v737_v22, 1  ;;  %1211 = vmatprep.mubr.bf16.mxu1 %v6277_v42  ;;  %4503 = vmatprep.mubr.msk.bf16.mxu0 %vm383_vm1, %v4576_v0  ;;  %v2960_v44 = vsel %vm2420_vm2, %v2957_v46, %v2959_v59  ;;  %v5278_v63 = vadd.s32 1, %v1809_v55 }
 0x12c   : > { %v586_v14 = vpop.f32.mrf.mxu0  ;;  %v739_v30 = vpop.f32.mrf.mxu1  ;;  %v5274_v56 = vadd.f32 %v2960_v44, %v2851_v61  ;;  %v5284_v22 = vadd.s32 4294967295, %v1872_v17  ;;  %v1706_v47 = vadd.s32 192, %v4728_v6 }
 0x12d   : > { %v2737_v54 = vsel %vm2712_vm9, %v2734_v28, %v2736_v50  ;;  %v2463_v57 = vsel %vm2420_vm2, %v2460_v7, %v2462_v43  ;;  %v2961_v29 = vrot.slane %v739_v30, 7  ;;  %6284 = vst [vmem:[#allocation29_spill] sm:$0xff] %v5278_v63  ;;  %v1823_v30 = vand.u32 15, %v1697_v40 }
 0x12e   : > { %v2821_v0 = vsel %vm6219_vm7, %v2737_v54, 0.0  ;;  %v2538_v46 = vsel %vm6235_vm8, %v2463_v57, 0.0  ;;  %v588_v23 = vpop.f32.mrf.mxu0  ;;  %v741_v32 = vpop.f32.mrf.mxu1  ;;  %6285 = vst [vmem:[#allocation30_spill] sm:$0xff] %v5284_v22  ;;  %v2518_v54 = vsel %vm2130_vm5, %v2423_v41, 0.0  ;;  %vm6221_vm7 = vcmp.lt.s32.totalorder %v5278_v63, 16  ;;  %v4578_v41 = vld [vmem:[%s4741_s7 + $0x70] sm:$0xff]  }
 0x12f   : > { %v5287_v61 = vadd.f32 %v2538_v46, %v586_v14  ;;  %v2962_v28 = vsel %vm2420_vm2, %v2959_v59, %v2961_v29  ;;  %v2464_v7 = vrot.slane %v588_v23, 7  ;;  %v2738_v1 = vrot.slane %v741_v32, 1  ;;  %v2646_v23 = vld [vmem:[#allocation2 + $0x228] sm:$0xfe] }
 0x130   : > { %v590_v55 = vpop.f32.mrf.mxu0  ;;  %v743_v44 = vpop.f32.mrf.mxu1  ;;  %v3047_v57 = vsel %vm6220_vm10, %v2962_v28, 0.0  ;;  %v2853_v17 = vadd.f32 %v2821_v0, %v5106_v20  ;;  %v1886_v20 = vand.u32 15, %v1706_v47  ;;  %vm6239_vm10 = vcmp.ge.s32.totalorder %v5284_v22, 0 }
 0x131   : > { %v2739_v14 = vsel %vm2712_vm9, %v2736_v50, %v2738_v1  ;;  %v2465_v46 = vsel %vm2420_vm2, %v2462_v43, %v2464_v7  ;;  %v2963_v59 = vrot.slane %v743_v44, 7  ;;  %v5297_v32 = vadd.f32 %v3047_v57, %v2852_v58 }
 0x132   : > { %v5299_v62 = vadd.f32 %v2465_v46, %v590_v55  ;;  %v594_v40 = vpop.f32.mrf.mxu0  ;;  %v747_v11 = vpop.f32.mrf.mxu1  ;;  %4275 = vmatmul.mubr.msk.bf16.gmra.mxu1 %vm383_vm1, %v4578_v41  ;;  %4504 = vmatmul.mubr.msk.bf16.gmra.mxu0 %vm383_vm1, %v4577_v35  ;;  %v2854_v50 = vadd.f32 %v2739_v14, %v5134_v24  ;;  %v2940_v28 = vrot.slane %v2874_v12, 7  ;;  %v5310_v57 = vadd.s32 1, %v1823_v30  ;;  %v4579_v14 = vld [vmem:[#allocation2 + $0x730] sm:$0xff] }
 0x133   : > { %v2466_v0 = vrot.slane %v594_v40, 7  ;;  %v2740_v43 = vrot.slane %v747_v11, 1  ;;  %1221 = vmatprep.mubr.bf16.mxu1 %v6277_v42  ;;  %4507 = vmatprep.mubr.msk.bf16.mxu0 %vm383_vm1, %v4578_v41  ;;  %v2964_v58 = vsel %vm2420_vm2, %v2961_v29, %v2963_v59  ;;  %v2713_v46 = vrot.slane %v2646_v23, 1 }
 0x134   : > { %v596_v55 = vpop.f32.mrf.mxu0  ;;  %v749_v44 = vpop.f32.mrf.mxu1  ;;  %6286 = vst [vmem:[#allocation31_spill] sm:$0xff] %v5310_v57  ;;  %v5312_v35 = vadd.f32 %v2964_v58, %v2853_v17  ;;  %v2614_v40 = vadd.f32 %v4579_v14, %v2518_v54  ;;  %v5320_v30 = vadd.s32 4294967295, %v1886_v20  ;;  %v1699_v17 = vadd.s32 136, %v4728_v6 }
 0x135   : > { %v2741_v24 = vsel %vm2712_vm9, %v2738_v1, %v2740_v43  ;;  %v2467_v11 = vsel %vm2420_vm2, %v2464_v7, %v2466_v0  ;;  %v2965_v47 = vrot.slane %v749_v44, 7 }
 0x136   : > { %v2823_v42 = vsel %vm6221_vm7, %v2741_v24, 0.0  ;;  %v2540_v12 = vsel %vm6239_vm10, %v2467_v11, 0.0  ;;  %v598_v29 = vpop.f32.mrf.mxu0  ;;  %v751_v41 = vpop.f32.mrf.mxu1  ;;  %6287 = vst [vmem:[#allocation32_spill] sm:$0xff] %v5320_v30  ;;  %vm2305_vm7 = vcmp.lt.s32.totalorder %v5310_v57, 16  ;;  %v2715_v24 = vsel %vm2712_vm9, %v2713_v46, %v5067_v15  ;;  %v4580_v46 = vld [vmem:[%s4741_s7 + $0x78] sm:$0xff]  }
 0x137   : > { %v5323_v23 = vadd.f32 %v2540_v12, %v596_v55  ;;  %v2966_v1 = vsel %vm2420_vm2, %v2963_v59, %v2965_v47  ;;  %v2468_v7 = vrot.slane %v598_v29, 7  ;;  %v2742_v58 = vrot.slane %v751_v41, 1 }
 0x138   : > { %v600_v54 = vpop.f32.mrf.mxu0  ;;  %v753_v44 = vpop.f32.mrf.mxu1  ;;  %v3049_v20 = vsel %vm6225_vm13, %v2966_v1, 0.0  ;;  %v2855_v11 = vadd.f32 %v2823_v42, %v5144_v25  ;;  %v6288_v29 = vrot.slane %v5085_v27, 7  ;;  %v1837_v25 = vand.u32 15, %v1699_v17 }
 0x139   : > { %v2743_v55 = vsel %vm2712_vm9, %v2740_v43, %v2742_v58  ;;  %v2469_v14 = vsel %vm2420_vm2, %v2466_v0, %v2468_v7  ;;  %v2967_v59 = vrot.slane %v753_v44, 7  ;;  %v5334_v12 = vadd.f32 %v3049_v20, %v2854_v50 }
 0x13a   : > { %v2942_v41 = vsel %vm2420_vm2, %v2940_v28, %v6288_v29  ;;  %v5339_v2 = vadd.f32 %v2469_v14, %v600_v54  ;;  %v604_v63 = vpop.f32.mrf.mxu0  ;;  %v757_v15 = vpop.f32.mrf.mxu1  ;;  %4276 = vmatmul.mubr.msk.bf16.gmra.mxu1 %vm383_vm1, %v4580_v46  ;;  %4508 = vmatmul.mubr.msk.bf16.gmra.mxu0 %vm383_vm1, %v4580_v46  ;;  %v2856_v43 = vadd.f32 %v2743_v55, %v5171_v9  ;;  %vm6241_vm13 = vcmp.ge.s32.totalorder %v5320_v30, 0 }
 0x13b   : > { %v2470_v0 = vrot.slane %v604_v63, 7  ;;  %v2744_v42 = vrot.slane %v757_v15, 1  ;;  %v2968_v27 = vsel %vm2420_vm2, %v2965_v47, %v2967_v59  ;;  %v2842_v1 = vadd.f32 %v2715_v24, %v2614_v40 }
 0x13c   : > { %v606_v50 = vpop.f32.mrf.mxu0  ;;  %v759_v28 = vpop.f32.mrf.mxu1  ;;  %v1701_v54 = vadd.s32 152, %v4728_v6  ;;  %v5348_v44 = vadd.f32 %v2968_v27, %v2855_v11  ;;  %v3037_v9 = vsel %vm2130_vm5, %v2942_v41, 0.0  ;;  %v5358_v24 = vadd.s32 1, %v1837_v25 }
 0x13d   : > { %v2745_v20 = vsel %vm2712_vm9, %v2742_v58, %v2744_v42  ;;  %v2471_v14 = vsel %vm2420_vm2, %v2468_v7, %v2470_v0  ;;  %v2969_v17 = vrot.slane %v759_v28, 7  ;;  %v3069_v27 = vadd.f32 %v3037_v9, %v2842_v1 }
 0x13e   : > { %v2825_v63 = vsel %vm2305_vm7, %v2745_v20, 0.0  ;;  %v2542_v47 = vsel %vm6241_vm13, %v2471_v14, 0.0  ;;  %v608_v55 = vpop.f32.mrf.mxu0  ;;  %v761_v40 = vpop.f32.mrf.mxu1  ;;  %6289 = vst [vmem:[#allocation33_spill] sm:$0xff] %v5358_v24  ;;  %v1851_v41 = vand.u32 15, %v1701_v54  ;;  %v6290_v14 = vrot.slane %v4961_v49, 7 }
 0x13f   : > { %v5360_v11 = vadd.f32 %v2542_v47, %v606_v50  ;;  %v2970_v58 = vsel %vm2420_vm2, %v2967_v59, %v2969_v17  ;;  %v2472_v29 = vrot.slane %v608_v55, 7  ;;  %v2746_v7 = vrot.slane %v761_v40, 1 }
 0x140   : > { %v610_v15 = vpop.f32.mrf.mxu0  ;;  %v763_v46 = vpop.f32.mrf.mxu1  ;;  %v3051_v28 = vsel %vm6226_vm15, %v2970_v58, 0.0  ;;  %v2857_v20 = vadd.f32 %v2825_v63, %v5181_v4  ;;  %v1703_v54 = vadd.s32 168, %v4728_v6  ;;  %vm2307_vm1 = vcmp.lt.s32.totalorder %v5358_v24, 16 }
 0x141   : > { %v5369_v25 = vsel %vm2420_vm2, %v2472_v29, %v6290_v14  ;;  %v2747_v50 = vsel %vm2712_vm9, %v2744_v42, %v2746_v7  ;;  %v2473_v59 = vsel %vm2420_vm2, %v2470_v0, %v2472_v29  ;;  %v2971_v47 = vrot.slane %v763_v46, 7 }
 0x142   : > { %v5373_v55 = vadd.f32 %v2473_v59, %v610_v15  ;;  %v767_v40 = vpop.f32.mrf.mxu1  ;;  %v880_v1 = vpop.f32.mrf.mxu0  ;;  %v5376_v9 = vadd.f32 %v3051_v28, %v2856_v43  ;;  %v2858_v4 = vadd.f32 %v2747_v50, %v5208_v10  ;;  %v5386_v10 = vadd.s32 1, %v1851_v41 }
 0x143   : > { %v2748_v49 = vrot.slane %v767_v40, 1  ;;  %v3133_v63 = vadd.f32 %v3069_v27, %v880_v1  ;;  %v2972_v58 = vsel %vm2420_vm2, %v2969_v17, %v2971_v47  ;;  %v1865_v50 = vand.u32 15, %v1703_v54 }
 0x144   : > { %v769_v42 = vpop.f32.mrf.mxu1  ;;  %v882_v14 = vpop.f32.mrf.mxu0  ;;  %v5381_v0 = vadd.f32 %v2972_v58, %v2857_v20  ;;  %6291 = vst [vmem:[#allocation34_spill] sm:$0xff] %v5386_v10  ;;  %vm2309_vm15 = vcmp.lt.s32.totalorder %v5386_v10, 16 }
 0x145   : > { %v2749_v29 = vsel %vm2712_vm9, %v2746_v7, %v2748_v49  ;;  %v2973_v15 = vrot.slane %v769_v42, 7  ;;  %1398 = vst [vmem:[#allocation2 + $0x508] sm:$0xff] %v882_v14  ;;  %v5396_v54 = vadd.s32 1, %v1865_v50 }
 0x146   : > { %v2827_v43 = vsel %vm2307_vm1, %v2749_v29, 0.0  ;;  %v771_v46 = vpop.f32.mrf.mxu1  ;;  %v884_v28 = vpop.f32.mrf.mxu0 }
 0x147   : > { %v2974_v27 = vsel %vm2420_vm2, %v2971_v47, %v2973_v15  ;;  %v2750_v59 = vrot.slane %v771_v46, 1  ;;  %v3134_v17 = vadd.f32 %v5121_v38, %v884_v28  ;;  %v2859_v20 = vadd.f32 %v2827_v43, %v5219_v16  ;;  %6292 = vst [vmem:[#allocation35_spill] sm:$0xff] %v5396_v54 }
 0x148   : > { %v773_v40 = vpop.f32.mrf.mxu1  ;;  %v886_v1 = vpop.f32.mrf.mxu0  ;;  %v3053_v7 = vsel %vm6228_vm4, %v2974_v27, 0.0  ;;  %vm2311_vm4 = vcmp.lt.s32.totalorder %v5396_v54, 16 }
 0x149   : > { %v2751_v58 = vsel %vm2712_vm9, %v2748_v49, %v2750_v59  ;;  %v2975_v42 = vrot.slane %v773_v40, 7  ;;  %v5394_v14 = vadd.f32 %v3053_v7, %v2858_v4  ;;  %v3232_v28 = vrot.slane %v886_v1, 1 }
 0x14a   : > { %v777_v41 = vpop.f32.mrf.mxu1  ;;  %v890_v29 = vpop.f32.mrf.mxu0  ;;  %v2860_v47 = vadd.f32 %v2751_v58, %v5248_v48 }
 0x14b   : > { %v2752_v38 = vrot.slane %v777_v41, 1  ;;  %v3135_v16 = vadd.f32 %v5142_v3, %v890_v29  ;;  %v2976_v43 = vsel %vm2420_vm2, %v2973_v15, %v2975_v42  ;;  %v1705_v3 = vadd.s32 184, %v4728_v6 }
 0x14c   : > { %v3165_v46 = vld [vmem:[#allocation2 + $0x508] sm:$0xfe]  ;;  %v779_v27 = vpop.f32.mrf.mxu1  ;;  %v892_v49 = vpop.f32.mrf.mxu0  ;;  %v5402_v40 = vadd.f32 %v2976_v43, %v2859_v20 }
 0x14d   : > { %v3231_v4 = vrot.slane %v3165_v46, 1  ;;  %v2753_v7 = vsel %vm2712_vm9, %v2750_v59, %v2752_v38  ;;  %v2977_v50 = vrot.slane %v779_v27, 7  ;;  %v3234_v18 = vrot.slane %v892_v49, 1 }
 0x14e   : > { %v2829_v48 = vsel %vm2309_vm15, %v2753_v7, 0.0  ;;  %v781_v58 = vpop.f32.mrf.mxu1  ;;  %v894_v41 = vpop.f32.mrf.mxu0  ;;  %v1879_v10 = vand.u32 15, %v1705_v3 }
 0x14f   : > { %v3233_v15 = vsel %vm2712_vm9, %v3231_v4, %v3232_v28  ;;  %v2978_v1 = vsel %vm2420_vm2, %v2975_v42, %v2977_v50  ;;  %v3235_v20 = vsel %vm2712_vm9, %v3232_v28, %v3234_v18  ;;  %v2754_v29 = vrot.slane %v781_v58, 1 }
 0x150   : > { %v3329_v59 = vsel %vm2291_vm11, %v3235_v20, 0.0  ;;  %v3136_v43 = vadd.f32 %v5158_v19, %v894_v41  ;;  %v783_v46 = vpop.f32.mrf.mxu1  ;;  %v896_v27 = vpop.f32.mrf.mxu0  ;;  %v3055_v49 = vsel %vm6234_vm6, %v2978_v1, 0.0  ;;  %v5417_v7 = vadd.f32 %v3233_v15, %v3133_v63 }
 0x151   : > { %v2755_v8 = vsel %vm2712_vm9, %v2752_v38, %v2754_v29  ;;  %v2979_v4 = vrot.slane %v783_v46, 7  ;;  %v3236_v52 = vrot.slane %v896_v27, 1  ;;  %v5420_v42 = vadd.f32 %v3055_v49, %v2860_v47 }
 0x152   : > { %v787_v28 = vpop.f32.mrf.mxu1  ;;  %v900_v58 = vpop.f32.mrf.mxu0  ;;  %v2861_v20 = vadd.f32 %v2829_v48, %v5258_v37  ;;  %v5423_v5 = vadd.f32 %v3329_v59, %v3134_v17  ;;  %v2862_v19 = vadd.f32 %v2755_v8, %v5287_v61  ;;  %v1708_v15 = vadd.s32 208, %v4728_v6 }
 0x153   : > { %v3237_v41 = vsel %vm2712_vm9, %v3234_v18, %v3236_v52  ;;  %v2756_v1 = vrot.slane %v787_v28, 1  ;;  %v3137_v63 = vadd.f32 %v5179_v33, %v900_v58  ;;  %v2980_v38 = vsel %vm2420_vm2, %v2977_v50, %v2979_v4 }
 0x154   : > { %v789_v47 = vpop.f32.mrf.mxu1  ;;  %v902_v46 = vpop.f32.mrf.mxu0  ;;  %v5430_v27 = vadd.f32 %v2980_v38, %v2861_v20  ;;  %v5432_v3 = vadd.f32 %v3237_v41, %v3135_v16  ;;  %v5437_v33 = vadd.s32 1, %v1879_v10  ;;  %v1707_v50 = vadd.s32 200, %v4728_v6 }
 0x155   : > { %v2757_v37 = vsel %vm2712_vm9, %v2754_v29, %v2756_v1  ;;  %v2981_v17 = vrot.slane %v789_v47, 7  ;;  %v3238_v48 = vrot.slane %v902_v46, 1  ;;  %v1900_v58 = vand.u32 15, %v1708_v15 }
 0x156   : > { %v2831_v8 = vsel %vm2311_vm4, %v2757_v37, 0.0  ;;  %v791_v18 = vpop.f32.mrf.mxu1  ;;  %v904_v61 = vpop.f32.mrf.mxu0  ;;  %6293 = vst [vmem:[#allocation36_spill] sm:$0xff] %v5437_v33  ;;  %vm2313_vm6 = vcmp.lt.s32.totalorder %v5437_v33, 16  ;;  %v1893_v15 = vand.u32 15, %v1707_v50 }
 0x157   : > { %v2982_v59 = vsel %vm2420_vm2, %v2979_v4, %v2981_v17  ;;  %v3239_v49 = vsel %vm2712_vm9, %v3236_v52, %v3238_v48  ;;  %v2758_v28 = vrot.slane %v791_v18, 1  ;;  %v3138_v16 = vadd.f32 %v5195_v45, %v904_v61 }
 0x158   : > { %v3331_v29 = vsel %vm6236_vm12, %v3239_v49, 0.0  ;;  %v793_v20 = vpop.f32.mrf.mxu1  ;;  %v906_v41 = vpop.f32.mrf.mxu0  ;;  %v3057_v38 = vsel %vm6235_vm8, %v2982_v59, 0.0  ;;  %v2863_v10 = vadd.f32 %v2831_v8, %v5299_v62  ;;  %v5458_v8 = vadd.s32 4294967295, %v1900_v58 }
 0x159   : > { %v2759_v47 = vsel %vm2712_vm9, %v2756_v1, %v2758_v28  ;;  %v2983_v46 = vrot.slane %v793_v20, 7  ;;  %v3240_v4 = vrot.slane %v906_v41, 1  ;;  %v5449_v37 = vadd.f32 %v3057_v38, %v2862_v19 }
 0x15a   : > { %v797_v52 = vpop.f32.mrf.mxu1  ;;  %v910_v45 = vpop.f32.mrf.mxu0  ;;  %v5452_v18 = vadd.f32 %v3331_v29, %v3136_v43  ;;  %v2864_v61 = vadd.f32 %v2759_v47, %v5323_v23  ;;  %6294 = vst [vmem:[#allocation37_spill] sm:$0xff] %v5458_v8  ;;  %vm6243_vm8 = vcmp.ge.s32.totalorder %v5458_v8, 0 }
 0x15b   : > { %v3241_v49 = vsel %vm2712_vm9, %v3238_v48, %v3240_v4  ;;  %v2760_v59 = vrot.slane %v797_v52, 1  ;;  %v3139_v62 = vadd.f32 %v5217_v60, %v910_v45  ;;  %v2984_v1 = vsel %vm2420_vm2, %v2981_v17, %v2983_v46 }
 0x15c   : > { %v799_v19 = vpop.f32.mrf.mxu1  ;;  %v912_v20 = vpop.f32.mrf.mxu0  ;;  %v5460_v41 = vadd.f32 %v2984_v1, %v2863_v10  ;;  %v5462_v38 = vadd.f32 %v3241_v49, %v3137_v63  ;;  %v5467_v60 = vadd.s32 1, %v1893_v15  ;;  %v1709_v17 = vadd.s32 216, %v4728_v6 }
 0x15d   : > { %v2761_v43 = vsel %vm2712_vm9, %v2758_v28, %v2760_v59  ;;  %v2985_v50 = vrot.slane %v799_v19, 7  ;;  %v3242_v29 = vrot.slane %v912_v20, 1 }
 0x15e   : > { %v2833_v23 = vsel %vm2313_vm6, %v2761_v43, 0.0  ;;  %v801_v48 = vpop.f32.mrf.mxu1  ;;  %v914_v47 = vpop.f32.mrf.mxu0  ;;  %6295 = vst [vmem:[#allocation38_spill] sm:$0xff] %v5467_v60  ;;  %vm2315_vm12 = vcmp.lt.s32.totalorder %v5467_v60, 16 }
 0x15f   : > { %v2986_v58 = vsel %vm2420_vm2, %v2983_v46, %v2985_v50  ;;  %v3243_v10 = vsel %vm2712_vm9, %v3240_v4, %v3242_v29  ;;  %v2762_v52 = vrot.slane %v801_v48, 1  ;;  %v3140_v63 = vadd.f32 %v5235_v39, %v914_v47 }
 0x160   : > { %v3333_v28 = vsel %vm2295_vm14, %v3243_v10, 0.0  ;;  %v803_v45 = vpop.f32.mrf.mxu1  ;;  %v916_v49 = vpop.f32.mrf.mxu0  ;;  %v3059_v15 = vsel %vm6239_vm10, %v2986_v58, 0.0  ;;  %v2865_v1 = vadd.f32 %v2833_v23, %v5339_v2  ;;  %v1907_v48 = vand.u32 15, %v1709_v17 }
 0x161   : > { %v2763_v19 = vsel %vm2712_vm9, %v2760_v59, %v2762_v52  ;;  %v2987_v46 = vrot.slane %v803_v45, 7  ;;  %v3244_v20 = vrot.slane %v916_v49, 1  ;;  %v5480_v4 = vadd.f32 %v3059_v15, %v2864_v61 }
 0x162   : > { %v807_v43 = vpop.f32.mrf.mxu1  ;;  %v920_v39 = vpop.f32.mrf.mxu0  ;;  %v5483_v47 = vadd.f32 %v3333_v28, %v3138_v16  ;;  %v2866_v10 = vadd.f32 %v2763_v19, %v5360_v11  ;;  %v2544_v16 = vsel %vm6243_vm8, %v5369_v25, 0.0 }
 0x163   : > { %v3245_v22 = vsel %vm2712_vm9, %v3242_v29, %v3244_v20  ;;  %v2764_v58 = vrot.slane %v807_v43, 1  ;;  %v3141_v2 = vadd.f32 %v5256_v13, %v920_v39  ;;  %v2988_v59 = vsel %vm2420_vm2, %v2985_v50, %v2987_v46  ;;  %v4581_v43 = vld [vmem:[#allocation2 + $0x1f0] sm:$0xff] }
 0x164   : > { %v809_v23 = vpop.f32.mrf.mxu1  ;;  %v922_v45 = vpop.f32.mrf.mxu0  ;;  %v5489_v61 = vadd.f32 %v2988_v59, %v2865_v1  ;;  %v5491_v49 = vadd.f32 %v3245_v22, %v3139_v62  ;;  %v5499_v50 = vadd.s32 1, %v1907_v48  ;;  %v1711_v1 = vadd.s32 232, %v4728_v6 }
 0x165   : > { %v2765_v17 = vsel %vm2712_vm9, %v2762_v52, %v2764_v58  ;;  %v2989_v11 = vrot.slane %v809_v23, 7  ;;  %v3246_v28 = vrot.slane %v922_v45, 1  ;;  %v2640_v52 = vadd.f32 %v4581_v43, %v2544_v16 }
 0x166   : > { %v2835_v29 = vsel %vm2315_vm12, %v2765_v17, 0.0  ;;  %v811_v13 = vpop.f32.mrf.mxu1  ;;  %v924_v15 = vpop.f32.mrf.mxu0  ;;  %6296 = vst [vmem:[#allocation39_spill] sm:$0xff] %v5499_v50  ;;  %vm2317_vm10 = vcmp.lt.s32.totalorder %v5499_v50, 16  ;;  %v1921_v16 = vand.u32 15, %v1711_v1 }
 0x167   : > { %v2990_v22 = vsel %vm2420_vm2, %v2987_v46, %v2989_v11  ;;  %v3247_v62 = vsel %vm2712_vm9, %v3244_v20, %v3246_v28  ;;  %v2766_v19 = vrot.slane %v811_v13, 1  ;;  %v3142_v25 = vadd.f32 %v5274_v56, %v924_v15 }
 0x168   : > { %v3335_v39 = vsel %vm6248_vm0, %v3247_v62, 0.0  ;;  %v813_v59 = vpop.f32.mrf.mxu1  ;;  %v926_v23 = vpop.f32.mrf.mxu0  ;;  %v3061_v48 = vsel %vm6241_vm13, %v2990_v22, 0.0  ;;  %v2867_v45 = vadd.f32 %v2835_v29, %v5373_v55 }
 0x169   : > { %v2767_v17 = vsel %vm2712_vm9, %v2764_v58, %v2766_v19  ;;  %v2991_v46 = vrot.slane %v813_v59, 7  ;;  %v3248_v31 = vrot.slane %v926_v23, 1  ;;  %v5511_v20 = vadd.f32 %v3061_v48, %v2866_v10 }
 0x16a   : > { %v817_v13 = vpop.f32.mrf.mxu1  ;;  %v930_v56 = vpop.f32.mrf.mxu0  ;;  %v5514_v15 = vadd.f32 %v3335_v39, %v3140_v63  ;;  %v2868_v62 = vadd.f32 %v2767_v17, %v2640_v52  ;;  %v5526_v39 = vadd.s32 1, %v1921_v16 }
 0x16b   : > { %v3249_v43 = vsel %vm2712_vm9, %v3246_v28, %v3248_v31  ;;  %v2768_v30 = vrot.slane %v817_v13, 1  ;;  %v3143_v22 = vadd.f32 %v5297_v32, %v930_v56  ;;  %v2992_v55 = vsel %vm2420_vm2, %v2989_v11, %v2991_v46 }
 0x16c   : > { %v819_v58 = vpop.f32.mrf.mxu1  ;;  %v932_v29 = vpop.f32.mrf.mxu0  ;;  %v5519_v59 = vadd.f32 %v2992_v55, %v2867_v45  ;;  %v5521_v10 = vadd.f32 %v3249_v43, %v3141_v2  ;;  %v6297_v43 = vld [vmem:[#allocation9_spill] sm:$0xff]  ;;  %vm2319_vm13 = vcmp.lt.s32.totalorder %v5526_v39, 16 }
 0x16d   : > { %v2769_v23 = vsel %vm2712_vm9, %v2766_v19, %v2768_v30  ;;  %v2993_v48 = vrot.slane %v819_v58, 7  ;;  %v3250_v1 = vrot.slane %v932_v29, 1 }
 0x16e   : > { %v2837_v63 = vsel %vm2317_vm10, %v2769_v23, 0.0  ;;  %v821_v52 = vpop.f32.mrf.mxu1  ;;  %v934_v28 = vpop.f32.mrf.mxu0 }
 0x16f   : > { %v2994_v32 = vsel %vm2420_vm2, %v2991_v46, %v2993_v48  ;;  %v3251_v11 = vsel %vm2712_vm9, %v3248_v31, %v3250_v1  ;;  %v2770_v17 = vrot.slane %v821_v52, 1  ;;  %v3144_v45 = vadd.f32 %v5312_v35, %v934_v28  ;;  %v6298_v52 = vld [vmem:[#allocation12_spill] sm:$0xff] }
 0x170   : > { %v3337_v2 = vsel %vm6244_vm3, %v3251_v11, 0.0  ;;  %v823_v19 = vpop.f32.mrf.mxu1  ;;  %v936_v13 = vpop.f32.mrf.mxu0  ;;  %v3063_v56 = vsel %vm6243_vm8, %v2994_v32, 0.0  ;;  %v2869_v55 = vadd.f32 %v2837_v63, %v6297_v43 }
 0x171   : > { %v2771_v16 = vsel %vm2712_vm9, %v2768_v30, %v2770_v17  ;;  %v2995_v58 = vrot.slane %v823_v19, 7  ;;  %v3252_v29 = vrot.slane %v936_v13, 1  ;;  %v5537_v46 = vadd.f32 %v3063_v56, %v2868_v62 }
 0x172   : > { %v827_v31 = vpop.f32.mrf.mxu1  ;;  %v940_v35 = vpop.f32.mrf.mxu0  ;;  %v5540_v23 = vadd.f32 %v3337_v2, %v3142_v25  ;;  %v2870_v28 = vadd.f32 %v2771_v16, %v6298_v52 }
 0x173   : > { %v3253_v11 = vsel %vm2712_vm9, %v3250_v1, %v3252_v29  ;;  %v2772_v8 = vrot.slane %v827_v31, 1  ;;  %v3145_v32 = vadd.f32 %v5334_v12, %v940_v35  ;;  %v2996_v63 = vsel %vm2420_vm2, %v2993_v48, %v2995_v58 }
 0x174   : > { %v829_v30 = vpop.f32.mrf.mxu1  ;;  %v942_v19 = vpop.f32.mrf.mxu0  ;;  %v5546_v13 = vadd.f32 %v2996_v63, %v2869_v55  ;;  %v5548_v62 = vadd.f32 %v3253_v11, %v3143_v22  ;;  %v1713_v31 = vadd.s32 248, %v4728_v6  ;;  %v6299_v22 = vld [vmem:[#allocation27_spill] sm:$0xff]  ;;  %v6301_v63 = vld [vmem:[#allocation8_spill] sm:$0xff] }
 0x175   : > { %v2773_v56 = vsel %vm2712_vm9, %v2770_v17, %v2772_v8  ;;  %v2997_v43 = vrot.slane %v829_v30, 7  ;;  %v3254_v25 = vrot.slane %v942_v19, 1  ;;  %vm6300_vm8 = vcmp.lt.s32.totalorder %v6299_v22, 16  ;;  %v6303_v19 = vld [vmem:[#allocation13_spill] sm:$0xff] }
 0x176   : > { %v2839_v2 = vsel %vm2319_vm13, %v2773_v56, 0.0  ;;  %v831_v16 = vpop.f32.mrf.mxu1  ;;  %v944_v1 = vpop.f32.mrf.mxu0  ;;  %vm6302_vm3 = vcmp.ge.s32.totalorder %v6301_v63, 0  ;;  %v1935_v22 = vand.u32 15, %v1713_v31  ;;  %v6305_v31 = vld [vmem:[#allocation29_spill] sm:$0xff] }
 0x177   : > { %v2998_v12 = vsel %vm2420_vm2, %v2995_v58, %v2997_v43  ;;  %v3255_v48 = vsel %vm2712_vm9, %v3252_v29, %v3254_v25  ;;  %v2774_v35 = vrot.slane %v831_v16, 1  ;;  %v3146_v55 = vadd.f32 %v5348_v44, %v944_v1  ;;  %v6304_v44 = vld [vmem:[#allocation15_spill] sm:$0xff] }
 0x178   : > { %v3339_v52 = vsel %vm6300_vm8, %v3255_v48, 0.0  ;;  %v833_v17 = vpop.f32.mrf.mxu1  ;;  %v946_v11 = vpop.f32.mrf.mxu0  ;;  %v3065_v30 = vsel %vm6302_vm3, %v2998_v12, 0.0  ;;  %v2871_v56 = vadd.f32 %v2839_v2, %v6303_v19  ;;  %v5575_v63 = vadd.s32 1, %v1935_v22 }
 0x179   : > { %v2775_v51 = vsel %vm2712_vm9, %v2772_v8, %v2774_v35  ;;  %v2999_v6 = vrot.slane %v833_v17, 7  ;;  %v3256_v34 = vrot.slane %v946_v11, 1  ;;  %v5563_v58 = vadd.f32 %v3065_v30, %v2870_v28 }
 0x17a   : > { %v837_v29 = vpop.f32.mrf.mxu1  ;;  %v950_v16 = vpop.f32.mrf.mxu0  ;;  %v5565_v21 = vadd.f32 %v3339_v52, %v3144_v45  ;;  %v2872_v1 = vadd.f32 %v2775_v51, %v6304_v44  ;;  %vm6306_vm3 = vcmp.lt.s32.totalorder %v6305_v31, 16  ;;  %vm2321_vm0 = vcmp.lt.s32.totalorder %v5575_v63, 16 }
 0x17b   : > { %v3257_v48 = vsel %vm2712_vm9, %v3254_v25, %v3256_v34  ;;  %1665 = vst [vmem:[#allocation2 + $0x538] sm:$0xff] %v837_v29  ;;  %v3147_v12 = vadd.f32 %v5376_v9, %v950_v16  ;;  %v3000_v2 = vsel %vm2420_vm2, %v2997_v43, %v2999_v6  ;;  %v6307_v16 = vld [vmem:[#allocation11_spill] sm:$0xff] }
 0x17c   : > { %v839_v19 = vpop.f32.mrf.mxu1  ;;  %v952_v8 = vpop.f32.mrf.mxu0  ;;  %v5571_v17 = vadd.f32 %v3000_v2, %v2871_v56  ;;  %v5573_v28 = vadd.f32 %v3257_v48, %v3145_v32  ;;  %vm6308_vm8 = vcmp.ge.s32.totalorder %v6307_v16, 0 }
 0x17d   : > { %v3001_v11 = vrot.slane %v839_v19, 7  ;;  %v3258_v30 = vrot.slane %v952_v8, 1 }
 0x17e   : > { %v841_v45 = vpop.f32.mrf.mxu1  ;;  %v954_v52 = vpop.f32.mrf.mxu0 }
 0x17f   : > { %v3002_v51 = vsel %vm2420_vm2, %v2999_v6, %v3001_v11  ;;  %v3259_v25 = vsel %vm2712_vm9, %v3256_v34, %v3258_v30  ;;  %v3148_v9 = vadd.f32 %v5381_v0, %v954_v52 }
 0x180   : > { %v3341_v43 = vsel %vm6306_vm3, %v3259_v25, 0.0  ;;  %v843_v29 = vpop.f32.mrf.mxu1  ;;  %v956_v56 = vpop.f32.mrf.mxu0  ;;  %v3067_v32 = vsel %vm6308_vm8, %v3002_v51, 0.0 }
 0x181   : > { %1675 = vst [vmem:[#allocation2 + $0x5f8] sm:$0xff] %v843_v29  ;;  %v3260_v44 = vrot.slane %v956_v56, 1  ;;  %v5584_v48 = vadd.f32 %v3067_v32, %v2872_v1  ;;  %v5586_v22 = vadd.f32 %v3341_v43, %v3146_v55 }
 0x182   : > { %v2678_v2 = vld [vmem:[#allocation2 + $0x538] sm:$0x1]  ;;  %v960_v6 = vpop.f32.mrf.mxu0  ;;  %v1073_v19 = vpop.f32.mrf.mxu1 }
 0x183   : > { %v2776_v34 = vrot.slane %v2678_v2, 1  ;;  %v3261_v0 = vsel %vm2712_vm9, %v3258_v30, %v3260_v44  ;;  %v3149_v8 = vadd.f32 %v5394_v14, %v960_v6  ;;  %v6310_v30 = vld [vmem:[#allocation18_spill] sm:$0xff] }
 0x184   : > { %v962_v45 = vpop.f32.mrf.mxu0  ;;  %v1075_v52 = vpop.f32.mrf.mxu1  ;;  %v5591_v25 = vadd.f32 %v3261_v0, %v3147_v12 }
 0x185   : > { %v2777_v51 = vsel %vm2712_vm9, %v2774_v35, %v2776_v34  ;;  %v3262_v1 = vrot.slane %v962_v45, 1 }
 0x186   : > { %6309 = vst [vmem:[#allocation9_spill] sm:$0xff] %v5591_v25  ;;  %v2841_v55 = vsel %vm2321_vm0, %v2777_v51, 0.0  ;;  %v964_v43 = vpop.f32.mrf.mxu0  ;;  %v1077_v29 = vpop.f32.mrf.mxu1 }
 0x187   : > { %v3263_v56 = vsel %vm2712_vm9, %v3260_v44, %v3262_v1  ;;  %v3150_v32 = vadd.f32 %v5402_v40, %v964_v43  ;;  %1408 = vst [vmem:[#allocation2 + $0xc8] sm:$0xff] %v1077_v29  ;;  %v2873_v2 = vadd.f32 %v2841_v55, %v6310_v30 }
 0x188   : > { %v2906_v14 = vld [vmem:[#allocation2 + $0x5f8] sm:$0x7f]  ;;  %v3343_v12 = vsel %vm2305_vm7, %v3263_v56, 0.0  ;;  %v966_v6 = vpop.f32.mrf.mxu0  ;;  %v1079_v19 = vpop.f32.mrf.mxu1 }
 0x189   : > { %v3003_v35 = vrot.slane %v2906_v14, 7  ;;  %v3264_v34 = vrot.slane %v966_v6, 1  ;;  %v5601_v0 = vadd.f32 %v3343_v12, %v3148_v9 }
 0x18a   : > { %v970_v45 = vpop.f32.mrf.mxu0  ;;  %v5603_v52 = vpop.f32.mrf.mxu1 }
 0x18b   : > { %6311 = vst [vmem:[#allocation12_spill] sm:$0xff] %v5601_v0  ;;  %v3265_v44 = vsel %vm2712_vm9, %v3262_v1, %v3264_v34  ;;  %v3151_v40 = vadd.f32 %v5420_v42, %v970_v45  ;;  %v3004_v51 = vsel %vm2420_vm2, %v3001_v11, %v3003_v35  ;;  %v6250_v19 = vrot.slane %v5603_v52, 7 }
 0x18c   : > { %v972_v55 = vpop.f32.mrf.mxu0  ;;  %v1085_v43 = vpop.f32.mrf.mxu1  ;;  %v5608_v29 = vadd.f32 %v3004_v51, %v2873_v2  ;;  %v5610_v56 = vadd.f32 %v3265_v44, %v3149_v8 }
 0x18d   : > { %v3266_v30 = vrot.slane %v972_v55, 1 }
 0x18e   : > { %6312 = vst [vmem:[#allocation13_spill] sm:$0xff] %v5610_v56  ;;  %v3392_v14 = vld [vmem:[#allocation2 + $0xc8] sm:$0x80]  ;;  %v974_v6 = vpop.f32.mrf.mxu0  ;;  %v5612_v9 = vpop.f32.mrf.mxu1 }
 0x18f   : > { %v3458_v12 = vrot.slane %v3392_v14, 7  ;;  %v3267_v1 = vsel %vm2712_vm9, %v3264_v34, %v3266_v30  ;;  %v3152_v42 = vadd.f32 %v5430_v27, %v974_v6 }
 0x190   : > { %v3345_v11 = vsel %vm2307_vm1, %v3267_v1, 0.0  ;;  %v976_v35 = vpop.f32.mrf.mxu0  ;;  %v5619_v2 = vpop.f32.mrf.mxu1 }
 0x191   : > { %v3460_v8 = vsel %vm2420_vm2, %v3458_v12, %v6250_v19  ;;  %v3268_v45 = vrot.slane %v976_v35, 1  ;;  %v5624_v44 = vadd.f32 %v3345_v11, %v3150_v32 }
 0x192   : > { %v3555_v51 = vsel %vm2130_vm5, %v3460_v8, 0.0  ;;  %v980_v55 = vpop.f32.mrf.mxu0  ;;  %v5628_v34 = vpop.f32.mrf.mxu1 }
 0x193   : > { %6313 = vst [vmem:[#allocation15_spill] sm:$0xff] %v5624_v44  ;;  %v3587_v27 = vadd.f32 %v3555_v51, %v5417_v7  ;;  %v3269_v14 = vsel %vm2712_vm9, %v3266_v30, %v3268_v45  ;;  %v3153_v6 = vadd.f32 %v5449_v37, %v980_v55  ;;  %v3715_v44 = vld [vmem:[#allocation2 + $0x5a8] sm:$0x1] }
 0x194   : > { %v982_v1 = vpop.f32.mrf.mxu0  ;;  %v5633_v16 = vpop.f32.mrf.mxu1  ;;  %v5635_v24 = vadd.f32 %v3269_v14, %v3151_v40 }
 0x195   : > { %v5637_v12 = vadd.f32 %v3587_v27, %v1085_v43  ;;  %v3270_v32 = vrot.slane %v982_v1, 1 }
 0x196   : > { %6314 = vst [vmem:[#allocation18_spill] sm:$0xff] %v5635_v24  ;;  %v984_v11 = vpop.f32.mrf.mxu0  ;;  %v5639_v36 = vpop.f32.mrf.mxu1 }
 0x197   : > { %v3271_v35 = vsel %vm2712_vm9, %v3268_v45, %v3270_v32  ;;  %v3154_v8 = vadd.f32 %v5460_v41, %v984_v11  ;;  %v3465_v0 = vrot.slane %v5639_v36, 7 }
 0x198   : > { %v3347_v30 = vsel %vm2309_vm15, %v3271_v35, 0.0  ;;  %v986_v51 = vpop.f32.mrf.mxu0  ;;  %v5645_v37 = vpop.f32.mrf.mxu1 }
 0x199   : > { %v3272_v55 = vrot.slane %v986_v51, 1  ;;  %v5647_v19 = vadd.f32 %v3347_v30, %v3152_v42 }
 0x19a   : > { %v990_v40 = vpop.f32.mrf.mxu0  ;;  %v5649_v43 = vpop.f32.mrf.mxu1 }
 0x19b   : > { %6316 = vst [vmem:[#allocation40_spill] sm:$0xff] %v5647_v19  ;;  %v3273_v27 = vsel %vm2712_vm9, %v3270_v32, %v3272_v55  ;;  %v3155_v14 = vadd.f32 %v5480_v4, %v990_v40 }
 0x19c   : > { %v992_v1 = vpop.f32.mrf.mxu0  ;;  %v5653_v45 = vpop.f32.mrf.mxu1  ;;  %v5655_v41 = vadd.f32 %v3273_v27, %v3153_v6 }
 0x19d   : > { %v3274_v11 = vrot.slane %v992_v1, 1 }
 0x19e   : > { %6317 = vst [vmem:[#allocation41_spill] sm:$0xff] %v5655_v41  ;;  %v994_v35 = vpop.f32.mrf.mxu0  ;;  %v5657_v7 = vpop.f32.mrf.mxu1 }
 0x19f   : > { %v3275_v51 = vsel %vm2712_vm9, %v3272_v55, %v3274_v11  ;;  %v3156_v42 = vadd.f32 %v5489_v61, %v994_v35 }
 0x1a0   : > { %v3349_v30 = vsel %vm2311_vm4, %v3275_v51, 0.0  ;;  %v996_v57 = vpop.f32.mrf.mxu0  ;;  %v5663_v32 = vpop.f32.mrf.mxu1 }
 0x1a1   : > { %v3276_v4 = vrot.slane %v996_v57, 1  ;;  %v5665_v40 = vadd.f32 %v3349_v30, %v3154_v8 }
 0x1a2   : > { %v1000_v31 = vpop.f32.mrf.mxu0  ;;  %v5667_v6 = vpop.f32.mrf.mxu1 }
 0x1a3   : > { %6318 = vst [vmem:[#allocation42_spill] sm:$0xff] %v5665_v40  ;;  %v3277_v27 = vsel %vm2712_vm9, %v3274_v11, %v3276_v4  ;;  %v3157_v1 = vadd.f32 %v5511_v20, %v1000_v31 }
 0x1a4   : > { %v1002_v41 = vpop.f32.mrf.mxu0  ;;  %v5671_v55 = vpop.f32.mrf.mxu1  ;;  %v5673_v61 = vadd.f32 %v3277_v27, %v3155_v14 }
 0x1a5   : > { %v3278_v35 = vrot.slane %v1002_v41, 1 }
 0x1a6   : > { %6319 = vst [vmem:[#allocation43_spill] sm:$0xff] %v5673_v61  ;;  %v1004_v51 = vpop.f32.mrf.mxu0  ;;  %v5675_v54 = vpop.f32.mrf.mxu1 }
 0x1a7   : > { %v3279_v57 = vsel %vm2712_vm9, %v3276_v4, %v3278_v35  ;;  %v3158_v8 = vadd.f32 %v5519_v59, %v1004_v51 }
 0x1a8   : > { %v3351_v30 = vsel %vm2313_vm6, %v3279_v57, 0.0  ;;  %v1006_v40 = vpop.f32.mrf.mxu0  ;;  %v5681_v11 = vpop.f32.mrf.mxu1 }
 0x1a9   : > { %v3280_v20 = vrot.slane %v1006_v40, 1  ;;  %v5683_v31 = vadd.f32 %v3351_v30, %v3156_v42 }
 0x1aa   : > { %v1010_v19 = vpop.f32.mrf.mxu0  ;;  %v5685_v14 = vpop.f32.mrf.mxu1 }
 0x1ab   : > { %6320 = vst [vmem:[#allocation44_spill] sm:$0xff] %v5683_v31  ;;  %v3281_v41 = vsel %vm2712_vm9, %v3278_v35, %v3280_v20  ;;  %v3159_v27 = vadd.f32 %v5537_v46, %v1010_v19  ;;  %v3475_v36 = vrot.slane %v5685_v14, 7  ;;  %v3473_v14 = vrot.slane %v5675_v54, 7 }
 0x1ac   : > { %v1012_v61 = vpop.f32.mrf.mxu0  ;;  %v5689_v4 = vpop.f32.mrf.mxu1  ;;  %v5691_v59 = vadd.f32 %v3281_v41, %v3157_v1 }
 0x1ad   : > { %v3282_v51 = vrot.slane %v1012_v61, 1 }
 0x1ae   : > { %6321 = vst [vmem:[#allocation45_spill] sm:$0xff] %v5691_v59  ;;  %v1014_v57 = vpop.f32.mrf.mxu0  ;;  %v5693_v33 = vpop.f32.mrf.mxu1 }
 0x1af   : > { %v3283_v40 = vsel %vm2712_vm9, %v3280_v20, %v3282_v51  ;;  %v3160_v42 = vadd.f32 %v5546_v13, %v1014_v57 }
 0x1b0   : > { %v3353_v30 = vsel %vm2315_vm12, %v3283_v40, 0.0  ;;  %v1016_v31 = vpop.f32.mrf.mxu0  ;;  %v5699_v35 = vpop.f32.mrf.mxu1 }
 0x1b1   : > { %v3284_v46 = vrot.slane %v1016_v31, 1  ;;  %v5701_v19 = vadd.f32 %v3353_v30, %v3158_v8 }
 0x1b2   : > { %v1020_v24 = vpop.f32.mrf.mxu0  ;;  %v5703_v1 = vpop.f32.mrf.mxu1 }
 0x1b3   : > { %6322 = vst [vmem:[#allocation46_spill] sm:$0xff] %v5701_v19  ;;  %v3285_v61 = vsel %vm2712_vm9, %v3282_v51, %v3284_v46  ;;  %v3161_v41 = vadd.f32 %v5563_v58, %v1020_v24  ;;  %v3479_v25 = vrot.slane %v5703_v1, 7  ;;  %v3477_v1 = vrot.slane %v5693_v33, 7 }
 0x1b4   : > { %v1022_v59 = vpop.f32.mrf.mxu0  ;;  %v5707_v20 = vpop.f32.mrf.mxu1  ;;  %v5709_v13 = vadd.f32 %v3285_v61, %v3159_v27  ;;  %v5721_v27 = vld [vmem:[#allocation2 + $0x730] sm:$0xff]  ;;  %v3812_v61 = vrot.slane %v3715_v44, 1 }
 0x1b5   : > { %v3286_v57 = vrot.slane %v1022_v59, 1  ;;  %v5724_v59 = vrot.slane %v5721_v27, 1 }
 0x1b6   : > { %6323 = vst [vmem:[#allocation47_spill] sm:$0xff] %v5709_v13  ;;  %v1024_v40 = vpop.f32.mrf.mxu0  ;;  %v5711_v60 = vpop.f32.mrf.mxu1  ;;  %v3463_v13 = vrot.slane %v5628_v34, 7 }
 0x1b7   : > { %v3287_v8 = vsel %vm2712_vm9, %v3284_v46, %v3286_v57  ;;  %v3162_v31 = vadd.f32 %v5571_v17, %v1024_v40  ;;  %v3461_v17 = vrot.slane %v5612_v9, 7  ;;  %v3813_v44 = vsel %vm2712_vm9, %v5724_v59, %v3812_v61 }
 0x1b8   : > { %v3355_v30 = vsel %vm2317_vm10, %v3287_v8, 0.0  ;;  %v1026_v51 = vpop.f32.mrf.mxu0  ;;  %v5717_v19 = vpop.f32.mrf.mxu1 }
 0x1b9   : > { %v3288_v24 = vrot.slane %v1026_v51, 1  ;;  %v5719_v58 = vadd.f32 %v3355_v30, %v3160_v42  ;;  %v3467_v42 = vrot.slane %v5649_v43, 7  ;;  %v3464_v34 = vsel %vm2420_vm2, %v3461_v17, %v3463_v13 }
 0x1ba   : > { %v1030_v46 = vpop.f32.mrf.mxu0  ;;  %v5727_v56 = vpop.f32.mrf.mxu1 }
 0x1bb   : > { %6324 = vst [vmem:[#allocation48_spill] sm:$0xff] %v5719_v58  ;;  %v3289_v40 = vsel %vm2712_vm9, %v3286_v57, %v3288_v24  ;;  %v3163_v8 = vadd.f32 %v5584_v48, %v1030_v46  ;;  %v3424_v57 = vld [vmem:[#allocation2 + $0x2e0] sm:$0x7f]  ;;  %v6327_v48 = vrot.slane %v5603_v52, 7  ;;  %v3468_v61 = vsel %vm2420_vm2, %v3465_v0, %v3467_v42 }
 0x1bc   : > { %v1032_v30 = vpop.f32.mrf.mxu0  ;;  %v5733_v51 = vpop.f32.mrf.mxu1  ;;  %v5735_v50 = vadd.f32 %v3289_v40, %v3161_v41  ;;  %v3466_v40 = vsel %vm2420_vm2, %v3463_v13, %v3465_v0 }
 0x1bd   : > { %6325 = vst [vmem:[#allocation49_spill] sm:$0xff] %v5733_v51  ;;  %v3290_v58 = vrot.slane %v1032_v30, 1  ;;  %v3462_v43 = vsel %vm2420_vm2, %v6327_v48, %v3461_v17  ;;  %v3471_v30 = vrot.slane %v5667_v6, 7  ;;  %v6329_v17 = vld [vmem:[#allocation6_spill] sm:$0xff]  ;;  %v3469_v6 = vrot.slane %v5657_v7, 7 }
 0x1be   : > { %6326 = vst [vmem:[#allocation50_spill] sm:$0xff] %v5735_v50  ;;  %v1034_v9 = vpop.f32.mrf.mxu0  ;;  %v5741_v53 = vpop.f32.mrf.mxu1  ;;  %vm6330_vm5 = vcmp.ge.s32.totalorder %v6329_v17, 0  ;;  %v3476_v7 = vsel %vm2420_vm2, %v3473_v14, %v3475_v36 }
 0x1bf   : > { %v3291_v46 = vsel %vm2712_vm9, %v3288_v24, %v3290_v58  ;;  %v5748_v41 = vadd.f32 %v5608_v29, %v1034_v9  ;;  %v3557_v24 = vsel %vm6330_vm5, %v3464_v34, 0.0  ;;  %v3521_v9 = vrot.slane %v3424_v57, 7 }
 0x1c0   : > { %v5754_v50 = vpop.f32.mrf.mxu0  ;;  %v5756_v51 = vpop.f32.mrf.mxu1  ;;  %v3357_v52 = vsel %vm2319_vm13, %v3291_v46, 0.0  ;;  %v5773_v34 = vsel %vm2321_vm0, %v3813_v44, 0.0  ;;  %v3472_v54 = vsel %vm2420_vm2, %v3469_v6, %v3471_v30  ;;  %v3589_v17 = vadd.f32 %v3557_v24, %v5432_v3  ;;  %v6334_v3 = vld [vmem:[#allocation10_spill] sm:$0xff] }
 0x1c1   : > { %6328 = vst [vmem:[#allocation51_spill] sm:$0xff] %v5756_v51  ;;  %v3292_v29 = vrot.slane %v5754_v50, 1  ;;  %v5763_v48 = vadd.f32 %v3357_v52, %v3162_v31  ;;  %v3197_v51 = vld [vmem:[#allocation2 + $0x4a0] sm:$0x1]  ;;  %v3588_v50 = vadd.f32 %v3462_v43, %v5423_v5  ;;  %v6331_v31 = vld [vmem:[#allocation7_spill] sm:$0xff]  ;;  %v3590_v5 = vadd.f32 %v3466_v40, %v5452_v18 }
 0x1c2   : > { %v5769_v26 = vpop.f32.mrf.mxu1  ;;  %v4481_v46 = vpop.f32.mrf.mxu0  ;;  %vm6332_vm3 = vcmp.ge.s32.totalorder %v6331_v31, 0  ;;  %v3481_v43 = vrot.slane %v5711_v60, 7  ;;  %v6333_v31 = vrot.slane %v5721_v27, 7  ;;  %vm6335_vm8 = vcmp.ge.s32.totalorder %v6334_v3, 0 }
 0x1c3   : > { %v3559_v57 = vsel %vm6332_vm3, %v3468_v61, 0.0  ;;  %v3293_v0 = vsel %vm2712_vm9, %v3290_v58, %v3292_v29  ;;  %1419 = vst [vmem:[#allocation2 + $0x760] sm:$0xff] %v4481_v46  ;;  %v3294_v61 = vrot.slane %v3197_v51, 1  ;;  %v3480_v46 = vsel %vm2420_vm2, %v3477_v1, %v3479_v25  ;;  %v6336_v51 = vld [vmem:[#allocation14_spill] sm:$0xff] }
 0x1c4   : > { %v5782_v13 = vadd.f32 %v3293_v0, %v3163_v8  ;;  %v5784_v52 = vpop.f32.mrf.mxu1  ;;  %v1266_v44 = vpop.f32.mrf.mxu0  ;;  %v3591_v58 = vadd.f32 %v3559_v57, %v5462_v38  ;;  %v5794_v33 = vsel %vm2420_vm2, %v6333_v31, %v3521_v9  ;;  %v3561_v18 = vsel %vm6335_vm8, %v3472_v54, 0.0 }
 0x1c5   : > { %v3470_v44 = vsel %vm2420_vm2, %v3467_v42, %v3469_v6  ;;  %v3474_v60 = vsel %vm2420_vm2, %v3471_v30, %v3473_v14  ;;  %vm6337_vm5 = vcmp.ge.s32.totalorder %v6336_v51, 0  ;;  %v3652_v40 = vadd.f32 %v3588_v50, %v5619_v2  ;;  %v6338_v14 = vld [vmem:[#allocation16_spill] sm:$0xff] }
 0x1c6   : > { %v5796_v8 = vpop.f32.mrf.mxu1  ;;  %v4482_v0 = vpop.f32.mrf.mxu0  ;;  %v3563_v38 = vsel %vm6337_vm5, %v3476_v7, 0.0  ;;  %v3478_v24 = vsel %vm2420_vm2, %v3475_v36, %v3477_v1  ;;  %v3483_v9 = vrot.slane %v5727_v56, 7  ;;  %v5812_v42 = vsel %vm2712_vm9, %v5724_v59, %v5724_v59 }
 0x1c7   : > { %v5815_v6 = vadd.f32 %v3589_v17, %v5633_v16  ;;  %v5818_v30 = vadd.f32 %v3590_v5, %v5645_v37  ;;  %vm6339_vm3 = vcmp.ge.s32.totalorder %v6338_v14, 0  ;;  %v3482_v36 = vsel %vm2420_vm2, %v3479_v25, %v3481_v43 }
 0x1c8   : > { %v5807_v57 = vpop.f32.mrf.mxu1  ;;  %v1269_v31 = vpop.f32.mrf.mxu0  ;;  %v3565_v2 = vsel %vm6339_vm3, %v3480_v46, 0.0  ;;  %v3592_v56 = vadd.f32 %v3470_v44, %v5483_v47  ;;  %v3593_v50 = vadd.f32 %v3561_v18, %v5491_v49  ;;  %v3594_v54 = vadd.f32 %v3474_v60, %v5514_v15 }
 0x1c9   : > { %v3595_v7 = vadd.f32 %v3563_v38, %v5521_v10  ;;  %v5830_v37 = vadd.f32 %v3591_v58, %v5653_v45  ;;  %v3596_v17 = vadd.f32 %v3478_v24, %v5540_v23  ;;  %v3750_v25 = vrot.slane %v4482_v0, 1 }
 0x1ca   : > { %v3683_v1 = vld [vmem:[#allocation2 + $0x760] sm:$0xfe]  ;;  %v5827_v3 = vpop.f32.mrf.mxu1  ;;  %v4485_v16 = vpop.f32.mrf.mxu0  ;;  %v3597_v47 = vadd.f32 %v3565_v2, %v5548_v62  ;;  %v3598_v49 = vadd.f32 %v3482_v36, %v5565_v21  ;;  %v3484_v15 = vsel %vm2420_vm2, %v3481_v43, %v3483_v9  ;;  %v3295_v10 = vsel %vm2712_vm9, %v3292_v29, %v3294_v61  ;;  %v5886_v36 = vld [vmem:[%s6197_s2] ss:$0 sm:$0xff] }
 0x1cb   : > { %v3749_v5 = vrot.slane %v3683_v1, 1  ;;  %v3485_v18 = vrot.slane %v5741_v53, 7  ;;  %v3487_v45 = vrot.slane %v5769_v26, 7  ;;  %v5843_v0 = vadd.f32 %v3592_v56, %v5663_v32 }
 0x1cc   : > { %v5837_v46 = vpop.f32.mrf.mxu1  ;;  %v1282_v44 = vpop.f32.mrf.mxu0  ;;  %v5846_v62 = vadd.f32 %v3593_v50, %v5671_v55  ;;  %v5849_v21 = vadd.f32 %v3594_v54, %v5681_v11  ;;  %v5852_v29 = vadd.f32 %v3595_v7, %v5689_v4  ;;  %v5858_v43 = vadd.f32 %v3596_v17, %v5699_v35  ;;  %v6340_v4 = vld [vmem:[#allocation20_spill] sm:$0xff]  ;;  %v6343_v17 = vld [vmem:[#allocation22_spill] sm:$0xff] }
 0x1cd   : > { %v3751_v23 = vsel %vm2712_vm9, %v3749_v5, %v3750_v25  ;;  %v3752_v58 = vrot.slane %v1282_v44, 1  ;;  %v3359_v32 = vsel %vm2321_vm0, %v3295_v10, 0.0  ;;  %v5865_v11 = vadd.f32 %v3597_v47, %v5707_v20  ;;  %v6345_v10 = vld [vmem:[#allocation19_spill] sm:$0xff] }
 0x1ce   : > { %v5855_v53 = vpop.f32.mrf.mxu1  ;;  %v4486_v26 = vpop.f32.mrf.mxu0  ;;  %v3878_v55 = vadd.f32 %v3751_v23, %v5637_v12  ;;  %vm6341_vm8 = vcmp.ge.s32.totalorder %v6340_v4, 0  ;;  %v5874_v63 = vadd.f32 %v3598_v49, %v5717_v19  ;;  %v3486_v12 = vsel %vm2420_vm2, %v3483_v9, %v3485_v18  ;;  %v6347_v4 = vld [vmem:[#allocation9_spill] sm:$0xff] }
 0x1cf   : > { %v3753_v61 = vsel %vm2712_vm9, %v3750_v25, %v3752_v58  ;;  %v3567_v60 = vsel %vm6341_vm8, %v3484_v15, 0.0  ;;  %v3758_v24 = vrot.slane %v4486_v26, 1  ;;  %v3488_v14 = vsel %vm2420_vm2, %v3485_v18, %v3487_v45 }
 0x1d0   : > { %v3847_v38 = vsel %vm2291_vm11, %v3753_v61, 0.0  ;;  %v5871_v31 = vpop.f32.mrf.mxu1  ;;  %v1285_v35 = vpop.f32.mrf.mxu0  ;;  %v3391_v2 = vadd.f32 %v3359_v32, %v5748_v41  ;;  %v3491_v56 = vrot.slane %v5827_v3, 7  ;;  %v3756_v50 = vrot.slane %v4485_v16, 1 }
 0x1d1   : > { %v3879_v20 = vadd.f32 %v3847_v38, %v3652_v40  ;;  %v3754_v19 = vrot.slane %v1285_v35, 1  ;;  %v3599_v7 = vadd.f32 %v3567_v60, %v5573_v28  ;;  %v3489_v1 = vrot.slane %v5796_v8, 7 }
 0x1d2   : > { %v5889_v54 = vpop.f32.mrf.mxu1  ;;  %v4489_v9 = vpop.f32.mrf.mxu0  ;;  %v3917_v40 = vadd.f32 %v5886_v36, %v3878_v55  ;;  %vm6344_vm11 = vcmp.ge.s32.totalorder %v6343_v17, 0  ;;  %v3759_v25 = vsel %vm2712_vm9, %v3756_v50, %v3758_v24  ;;  %v3600_v28 = vadd.f32 %v3486_v12, %v5586_v22 }
 0x1d3   : > { %v3918_v41 = vadd.f32 %v5886_v36, %v3879_v20  ;;  %v3569_v5 = vsel %vm6344_vm11, %v3488_v14, 0.0  ;;  %v3755_v47 = vsel %vm2712_vm9, %v3752_v58, %v3754_v19  ;;  %v3757_v16 = vsel %vm2712_vm9, %v3754_v19, %v3756_v50  ;;  %v6348_v20 = vld [vmem:[#allocation49_spill] sm:$0xff] }
 0x1d4   : > { %v5900_v49 = vpop.f32.mrf.mxu1  ;;  %v1298_v15 = vpop.f32.mrf.mxu0  ;;  %vm6346_vm0 = vcmp.lt.s32.totalorder %v6345_v10, 16  ;;  %v3880_v18 = vadd.f32 %v3755_v47, %v5815_v6  ;;  %v3618_v23 = vadd.f32 %v5794_v33, %v3391_v2  ;;  %v3492_v58 = vsel %vm2420_vm2, %v3489_v1, %v3491_v56  ;;  %v6349_v2 = vld [vmem:[#allocation51_spill] sm:$0xff] }
 0x1d5   : > { %v4368_v8 = vpack.c.bf16 %v3918_v41, %v3917_v40  ;;  %v3849_v44 = vsel %vm6346_vm0, %v3757_v16, 0.0  ;;  %v3760_v32 = vrot.slane %v1298_v15, 1  ;;  %v3601_v22 = vadd.f32 %v3569_v5, %v6347_v4  ;;  %v6353_v15 = vld [vmem:[#allocation12_spill] sm:$0xff] }
 0x1d6   : > { %v3881_v26 = vadd.f32 %v3849_v44, %v5818_v30  ;;  %v5911_v55 = vpop.f32.mrf.mxu1  ;;  %v4490_v61 = vpop.f32.mrf.mxu0  ;;  %v3490_v60 = vsel %vm2420_vm2, %v3487_v45, %v3489_v1  ;;  %v3882_v33 = vadd.f32 %v3759_v25, %v5830_v37  ;;  %v3919_v6 = vadd.f32 %v5886_v36, %v3880_v18  ;;  %v6350_v37 = vld [vmem:[#allocation24_spill] sm:$0xff] }
 0x1d7   : > { %4369 = vst [vmem:[%s5916_s17] sm:$0xff] %v4368_v8   ;;  %v3495_v30 = vrot.slane %v5889_v54, 7  ;;  %v3761_v38 = vsel %vm2712_vm9, %v3758_v24, %v3760_v32  ;;  %v3766_v35 = vrot.slane %v4490_v61, 1  ;;  %v5927_v45 = vadd.f32 %v3599_v7, %v6348_v20 }
 0x1d8   : > { %v3920_v51 = vadd.f32 %v5886_v36, %v3881_v26  ;;  %v5924_v12 = vpop.f32.mrf.mxu1  ;;  %v1301_v14 = vpop.f32.mrf.mxu0  ;;  %v5930_v50 = vadd.f32 %v3600_v28, %v6349_v2  ;;  %vm6351_vm5 = vcmp.ge.s32.totalorder %v6350_v37, 0  ;;  %v3851_v40 = vsel %vm2295_vm14, %v3761_v38, 0.0 }
 0x1d9   : > { %v3571_v19 = vsel %vm6351_vm5, %v3492_v58, 0.0  ;;  %v3493_v41 = vrot.slane %v5855_v53, 7  ;;  %v3764_v17 = vrot.slane %v4489_v9, 1  ;;  %v3883_v5 = vadd.f32 %v3851_v40, %v5843_v0 }
 0x1da   : > { %v4373_v24 = vpack.c.bf16 %v3920_v51, %v3919_v6  ;;  %v5938_v25 = vpop.f32.mrf.mxu1  ;;  %v4493_v47 = vpop.f32.mrf.mxu0  ;;  %v5941_v7 = vadd.f32 %v5721_v27, %v3618_v23  ;;  %v5944_v16 = vadd.f32 %v3601_v22, %v5784_v52  ;;  %v3602_v28 = vadd.f32 %v3490_v60, %v6353_v15  ;;  %v6354_v52 = vld [vmem:[#allocation13_spill] sm:$0xff]  ;;  %v6355_v60 = vld [vmem:[#allocation23_spill] sm:$0xff]  ;;  %v6362_v15 = vld [vmem:[#allocation18_spill] sm:$0xff] }
 0x1db   : > { %v3762_v8 = vrot.slane %v1301_v14, 1  ;;  %v3921_v10 = vadd.f32 %v5886_v36, %v3882_v33  ;;  %v3496_v53 = vsel %vm2420_vm2, %v3493_v41, %v3495_v30  ;;  %v3922_v0 = vadd.f32 %v5886_v36, %v3883_v5  ;;  %v6357_v14 = vld [vmem:[#allocation26_spill] sm:$0xff] }
 0x1dc   : > { %4445 = vst [vmem:[%s5916_s17 + $0x8] sm:$0xff] %v4373_v24   ;;  %v3767_v9 = vsel %vm2712_vm9, %v3764_v17, %v3766_v35  ;;  %v5954_v44 = vpop.f32.mrf.mxu1  ;;  %v1314_v18 = vpop.f32.mrf.mxu0  ;;  %v3603_v23 = vadd.f32 %v3571_v19, %v6354_v52  ;;  %v3494_v4 = vsel %vm2420_vm2, %v3491_v56, %v3493_v41  ;;  %vm6356_vm14 = vcmp.lt.s32.totalorder %v6355_v60, 16  ;;  %v6359_v19 = vld [vmem:[#allocation25_spill] sm:$0xff] }
 0x1dd   : > { %v3763_v58 = vsel %vm2712_vm9, %v3760_v32, %v3762_v8  ;;  %v3765_v26 = vsel %vm2712_vm9, %v3762_v8, %v3764_v17  ;;  %v3768_v61 = vrot.slane %v1314_v18, 1  ;;  %v4378_v22 = vpack.c.bf16 %v3922_v0, %v3921_v10 }
 0x1de   : > { %v3853_v33 = vsel %vm6356_vm14, %v3765_v26, 0.0  ;;  %v3884_v6 = vadd.f32 %v3763_v58, %v5846_v62  ;;  %v5965_v51 = vpop.f32.mrf.mxu1  ;;  %v4494_v38 = vpop.f32.mrf.mxu0  ;;  %vm6358_vm3 = vcmp.ge.s32.totalorder %v6357_v14, 0  ;;  %v3886_v32 = vadd.f32 %v3767_v9, %v5852_v29 }
 0x1df   : > { %v3573_v20 = vsel %vm6358_vm3, %v3496_v53, 0.0  ;;  %v3885_v2 = vadd.f32 %v3853_v33, %v5849_v21  ;;  %v3769_v3 = vsel %vm2712_vm9, %v3766_v35, %v3768_v61  ;;  %4446 = vst [vmem:[%s5916_s17 + $0x10] sm:$0xff] %v4378_v22   ;;  %v3497_v56 = vrot.slane %v5911_v55, 7  ;;  %v6361_v55 = vld [vmem:[#allocation15_spill] sm:$0xff] }
 0x1e0   : > { %v3923_v37 = vadd.f32 %v5886_v36, %v3884_v6  ;;  %vm6360_vm8 = vcmp.lt.s32.totalorder %v6359_v19, 16  ;;  %v3774_v1 = vrot.slane %v4494_v38, 1  ;;  %v5977_v40 = vpop.f32.mrf.mxu1  ;;  %v1317_v41 = vpop.f32.mrf.mxu0  ;;  %v3499_v29 = vrot.slane %v5938_v25, 7  ;;  %v6363_v33 = vld [vmem:[#allocation27_spill] sm:$0xff] }
 0x1e1   : > { %v3855_v62 = vsel %vm6360_vm8, %v3769_v3, 0.0  ;;  %v3924_v24 = vadd.f32 %v5886_v36, %v3885_v2  ;;  %v3772_v17 = vrot.slane %v4493_v47, 1  ;;  %v5983_v35 = vadd.f32 %v3602_v28, %v5807_v57  ;;  %v6365_v2 = vld [vmem:[#allocation40_spill] sm:$0xff] }
 0x1e2   : > { %v3887_v21 = vadd.f32 %v3855_v62, %v5858_v43  ;;  %v3604_v5 = vadd.f32 %v3494_v4, %v6361_v55  ;;  %v3605_v8 = vadd.f32 %v3573_v20, %v6362_v15  ;;  %v3770_v10 = vrot.slane %v1317_v41, 1  ;;  %v5987_v53 = vpop.f32.mrf.mxu1  ;;  %v4497_v0 = vpop.f32.mrf.mxu0 }
 0x1e3   : > { %v3925_v9 = vadd.f32 %v5886_v36, %v3886_v32  ;;  %v4383_v18 = vpack.c.bf16 %v3924_v24, %v3923_v37  ;;  %v3775_v47 = vsel %vm2712_vm9, %v3772_v17, %v3774_v1  ;;  %v3667_v43 = vadd.f32 %v3603_v23, %v5837_v46  ;;  %v6368_v24 = vld [vmem:[#allocation29_spill] sm:$0xff] }
 0x1e4   : > { %v3926_v52 = vadd.f32 %v5886_v36, %v3887_v21  ;;  %v3498_v57 = vsel %vm2420_vm2, %v3495_v30, %v3497_v56  ;;  %v3771_v28 = vsel %vm2712_vm9, %v3768_v61, %v3770_v10  ;;  %v3773_v58 = vsel %vm2712_vm9, %v3770_v10, %v3772_v17  ;;  %v5998_v26 = vpop.f32.mrf.mxu1  ;;  %v1330_v4 = vpop.f32.mrf.mxu0 }
 0x1e5   : > { %4447 = vst [vmem:[%s5916_s17 + $0x18] sm:$0xff] %v4383_v18   ;;  %v3500_v22 = vsel %vm2420_vm2, %v3497_v56, %v3499_v29  ;;  %vm6364_vm11 = vcmp.lt.s32.totalorder %v6363_v33, 16  ;;  %v3888_v54 = vadd.f32 %v3771_v28, %v5865_v11  ;;  %v3890_v30 = vadd.f32 %v3775_v47, %v5927_v45 }
 0x1e6   : > { %v4388_v60 = vpack.c.bf16 %v3926_v52, %v3925_v9  ;;  %v3857_v46 = vsel %vm6364_vm11, %v3773_v58, 0.0  ;;  %v3503_v61 = vrot.slane %v5987_v53, 7  ;;  %v3776_v6 = vrot.slane %v1330_v4, 1  ;;  %v1197_v38 = vpop.f32.mrf.mxu1  ;;  %v4498_v14 = vpop.f32.mrf.mxu0 }
 0x1e7   : > { %v3889_v23 = vadd.f32 %v3857_v46, %v5874_v63  ;;  %v3668_v20 = vadd.f32 %v3604_v5, %v5871_v31  ;;  %v6012_v32 = vadd.f32 %v3605_v8, %v5900_v49  ;;  %v3606_v3 = vadd.f32 %v3498_v57, %v6365_v2  ;;  %v6366_v31 = vld [vmem:[#allocation28_spill] sm:$0xff] }
 0x1e8   : > { %4448 = vst [vmem:[%s5916_s17 + $0x20] sm:$0xff] %v4388_v60   ;;  %v3927_v56 = vadd.f32 %v5886_v36, %v3888_v54  ;;  %v3501_v11 = vrot.slane %v5965_v51, 7  ;;  %v3777_v63 = vsel %vm2712_vm9, %v3774_v1, %v3776_v6  ;;  %v3782_v37 = vrot.slane %v4498_v14, 1  ;;  %v6020_v19 = vpop.f32.mrf.mxu1  ;;  %v1333_v62 = vpop.f32.mrf.mxu0  ;;  %v6372_v54 = vld [vmem:[#allocation30_spill] sm:$0xff] }
 0x1e9   : > { %v3928_v45 = vadd.f32 %v5886_v36, %v3889_v23  ;;  %vm6367_vm0 = vcmp.ge.s32.totalorder %v6366_v31, 0  ;;  %v3780_v41 = vrot.slane %v4497_v0, 1  ;;  %vm6369_vm5 = vcmp.lt.s32.totalorder %v6368_v24, 16  ;;  %v6374_v31 = vld [vmem:[#allocation42_spill] sm:$0xff] }
 0x1ea   : > { %v3575_v49 = vsel %vm6367_vm0, %v3500_v22, 0.0  ;;  %v3859_v17 = vsel %vm6369_vm5, %v3777_v63, 0.0  ;;  %v3778_v21 = vrot.slane %v1333_v62, 1  ;;  %v3929_v55 = vadd.f32 %v5886_v36, %v3890_v30  ;;  %v1203_v15 = vpop.f32.mrf.mxu1  ;;  %v4501_v8 = vpop.f32.mrf.mxu0  ;;  %v6371_v22 = vld [vmem:[#allocation41_spill] sm:$0xff] }
 0x1eb   : > { %v4393_v51 = vpack.c.bf16 %v3928_v45, %v3927_v56  ;;  %v3504_v5 = vsel %vm2420_vm2, %v3501_v11, %v3503_v61  ;;  %v3891_v1 = vadd.f32 %v3859_v17, %v5930_v50  ;;  %v3505_v10 = vrot.slane %v1197_v38, 7  ;;  %v6376_v17 = vld [vmem:[#allocation32_spill] sm:$0xff] }
 0x1ec   : > { %v3779_v53 = vsel %vm2712_vm9, %v3776_v6, %v3778_v21  ;;  %v3781_v9 = vsel %vm2712_vm9, %v3778_v21, %v3780_v41  ;;  %v3507_v18 = vrot.slane %v1203_v15, 7  ;;  %v3783_v52 = vsel %vm2712_vm9, %v3780_v41, %v3782_v37  ;;  %v6037_v58 = vpop.f32.mrf.mxu1  ;;  %v1346_v50 = vpop.f32.mrf.mxu0 }
 0x1ed   : > { %4449 = vst [vmem:[%s5916_s17 + $0x28] sm:$0xff] %v4393_v51   ;;  %v3930_v0 = vadd.f32 %v5886_v36, %v3891_v1  ;;  %v3861_v57 = vsel %vm2305_vm7, %v3781_v9, 0.0  ;;  %v3892_v28 = vadd.f32 %v3779_v53, %v5944_v16  ;;  %v3670_v4 = vadd.f32 %v3606_v3, %v5924_v12  ;;  %v6378_v1 = vld [vmem:[#allocation43_spill] sm:$0xff] }
 0x1ee   : > { %v3607_v60 = vadd.f32 %v3575_v49, %v6371_v22  ;;  %v3502_v33 = vsel %vm2420_vm2, %v3499_v29, %v3501_v11  ;;  %v3893_v46 = vadd.f32 %v3861_v57, %v5983_v35  ;;  %vm6373_vm14 = vcmp.ge.s32.totalorder %v6372_v54, 0  ;;  %v1207_v38 = vpop.f32.mrf.mxu1  ;;  %v4502_v14 = vpop.f32.mrf.mxu0 }
 0x1ef   : > { %v3577_v30 = vsel %vm6373_vm14, %v3504_v5, 0.0  ;;  %v4398_v23 = vpack.c.bf16 %v3930_v0, %v3929_v55  ;;  %v3931_v16 = vadd.f32 %v5886_v36, %v3892_v28  ;;  %v3784_v6 = vrot.slane %v1346_v50, 1  ;;  %v6380_v28 = vld [vmem:[#allocation45_spill] sm:$0xff] }
 0x1f0   : > { %v3894_v2 = vadd.f32 %v3783_v52, %v3667_v43  ;;  %v3932_v12 = vadd.f32 %v5886_v36, %v3893_v46  ;;  %v3508_v3 = vsel %vm2420_vm2, %v3505_v10, %v3507_v18  ;;  %v3790_v56 = vrot.slane %v4502_v14, 1  ;;  %v1209_v45 = vpop.f32.mrf.mxu1  ;;  %v1349_v63 = vpop.f32.mrf.mxu0 }
 0x1f1   : > { %4450 = vst [vmem:[%s5916_s17 + $0x30] sm:$0xff] %v4398_v23   ;;  %v3506_v25 = vsel %vm2420_vm2, %v3503_v61, %v3505_v10  ;;  %v3788_v29 = vrot.slane %v4501_v8, 1  ;;  %v3785_v35 = vsel %vm2712_vm9, %v3782_v37, %v3784_v6  ;;  %v3509_v11 = vrot.slane %v1207_v38, 7  ;;  %v6382_v38 = vld [vmem:[#allocation46_spill] sm:$0xff] }
 0x1f2   : > { %v3671_v62 = vadd.f32 %v3607_v60, %v5954_v44  ;;  %v3608_v49 = vadd.f32 %v3502_v33, %v6374_v31  ;;  %v4403_v43 = vpack.c.bf16 %v3932_v12, %v3931_v16  ;;  %v3863_v24 = vsel %vm2307_vm1, %v3785_v35, 0.0  ;;  %v1213_v37 = vpop.f32.mrf.mxu1  ;;  %v4505_v5 = vpop.f32.mrf.mxu0  ;;  %v6379_v44 = vld [vmem:[#allocation44_spill] sm:$0xff] }
 0x1f3   : > { %vm6377_vm7 = vcmp.ge.s32.totalorder %v6376_v17, 0  ;;  %v3895_v55 = vadd.f32 %v3863_v24, %v3668_v20  ;;  %v3791_v61 = vsel %vm2712_vm9, %v3788_v29, %v3790_v56  ;;  %v3786_v51 = vrot.slane %v1349_v63, 1 }
 0x1f4   : > { %v3579_v21 = vsel %vm6377_vm7, %v3508_v3, 0.0  ;;  %v3609_v15 = vadd.f32 %v3577_v30, %v6378_v1  ;;  %v3933_v8 = vadd.f32 %v5886_v36, %v3894_v2  ;;  %v3610_v10 = vadd.f32 %v3506_v25, %v6379_v44  ;;  %4451 = vst [vmem:[%s5916_s17 + $0x38] sm:$0xff] %v4403_v43   ;;  %v6068_v47 = vpop.f32.mrf.mxu1  ;;  %v1362_v57 = vpop.f32.mrf.mxu0 }
 0x1f5   : > { %v3511_v53 = vrot.slane %v1213_v37, 7  ;;  %v3934_v9 = vadd.f32 %v5886_v36, %v3895_v55  ;;  %v3510_v0 = vsel %vm2420_vm2, %v3507_v18, %v3509_v11  ;;  %v3787_v52 = vsel %vm2712_vm9, %v3784_v6, %v3786_v51 }
 0x1f6   : > { %v3789_v20 = vsel %vm2712_vm9, %v3786_v51, %v3788_v29  ;;  %v3611_v50 = vadd.f32 %v3579_v21, %v6380_v28  ;;  %v3898_v22 = vadd.f32 %v3791_v61, %v3671_v62  ;;  %v3896_v46 = vadd.f32 %v3787_v52, %v6012_v32  ;;  %v1217_v16 = vpop.f32.mrf.mxu1  ;;  %v4506_v6 = vpop.f32.mrf.mxu0  ;;  %v6383_v62 = vld [vmem:[#allocation37_spill] sm:$0xff] }
 0x1f7   : > { %v3865_v33 = vsel %vm2309_vm15, %v3789_v20, 0.0  ;;  %v4408_v54 = vpack.c.bf16 %v3934_v9, %v3933_v8  ;;  %v3512_v18 = vsel %vm2420_vm2, %v3509_v11, %v3511_v53  ;;  %v3792_v23 = vrot.slane %v1362_v57, 1 }
 0x1f8   : > { %v3897_v30 = vadd.f32 %v3865_v33, %v3670_v4  ;;  %v3612_v14 = vadd.f32 %v3510_v0, %v6382_v38  ;;  %v3935_v2 = vadd.f32 %v5886_v36, %v3896_v46  ;;  %v3796_v12 = vrot.slane %v4505_v5, 1  ;;  %v1219_v4 = vpop.f32.mrf.mxu1  ;;  %v1365_v11 = vpop.f32.mrf.mxu0  ;;  %v6386_v5 = vld [vmem:[#allocation47_spill] sm:$0xff]  ;;  %v6390_v46 = vld [vmem:[#allocation50_spill] sm:$0xff] }
 0x1f9   : > { %v3798_v3 = vrot.slane %v4506_v6, 1  ;;  %v3672_v25 = vadd.f32 %v3608_v49, %v5977_v40  ;;  %4452 = vst [vmem:[%s5916_s17 + $0x40] sm:$0xff] %v4408_v54   ;;  %v3793_v32 = vsel %vm2712_vm9, %v3790_v56, %v3792_v23  ;;  %v3513_v35 = vrot.slane %v1217_v16, 7 }
 0x1fa   : > { %v3936_v29 = vadd.f32 %v5886_v36, %v3897_v30  ;;  %v3673_v63 = vadd.f32 %v3609_v15, %v5998_v26  ;;  %vm6384_vm15 = vcmp.ge.s32.totalorder %v6383_v62, 0  ;;  %v3867_v41 = vsel %vm2311_vm4, %v3793_v32, 0.0  ;;  %v1223_v21 = vpop.f32.mrf.mxu1  ;;  %v4509_v55 = vpop.f32.mrf.mxu0 }
 0x1fb   : > { %v3581_v31 = vsel %vm6384_vm15, %v3512_v18, 0.0  ;;  %v3799_v24 = vsel %vm2712_vm9, %v3796_v12, %v3798_v3  ;;  %v3674_v40 = vadd.f32 %v3610_v10, %v6020_v19  ;;  %v3675_v49 = vadd.f32 %v3611_v50, %v6037_v58  ;;  %v6388_v50 = vld [vmem:[#allocation8_spill] sm:$0xff] }
 0x1fc   : > { %v4413_v17 = vpack.c.bf16 %v3936_v29, %v3935_v2  ;;  %v3899_v56 = vadd.f32 %v3867_v41, %v3672_v25  ;;  %v3937_v61 = vadd.f32 %v5886_v36, %v3898_v22  ;;  %v3676_v51 = vadd.f32 %v3612_v14, %v1209_v45  ;;  %v1225_v19 = vpop.f32.mrf.mxu1  ;;  %v1378_v58 = vpop.f32.mrf.mxu0 }
 0x1fd   : > { %v3794_v26 = vrot.slane %v1365_v11, 1  ;;  %v3515_v37 = vrot.slane %v1223_v21, 7  ;;  %v3613_v1 = vadd.f32 %v3581_v31, %v6386_v5  ;;  %v3902_v8 = vadd.f32 %v3799_v24, %v3675_v49  ;;  %v6394_v31 = vld [vmem:[#allocation11_spill] sm:$0xff] }
 0x1fe   : > { %4453 = vst [vmem:[%s5916_s17 + $0x48] sm:$0xff] %v4413_v17   ;;  %v3938_v15 = vadd.f32 %v5886_v36, %v3899_v56  ;;  %v3514_v44 = vsel %vm2420_vm2, %v3511_v53, %v3513_v35  ;;  %v3800_v45 = vrot.slane %v1378_v58, 1  ;;  %vm6389_vm4 = vcmp.ge.s32.totalorder %v6388_v50, 0  ;;  %v1227_v60 = vpop.f32.mrf.mxu1  ;;  %v4510_v53 = vpop.f32.mrf.mxu0 }
 0x1ff   : > { %v3795_v10 = vsel %vm2712_vm9, %v3792_v23, %v3794_v26  ;;  %v3797_v9 = vsel %vm2712_vm9, %v3794_v26, %v3796_v12  ;;  %v3516_v0 = vsel %vm2420_vm2, %v3513_v35, %v3515_v37  ;;  %v3517_v18 = vrot.slane %v1227_v60, 7  ;;  %v6391_v23 = vld [vmem:[#allocation48_spill] sm:$0xff] }
 0x200   : > { %v4418_v52 = vpack.c.bf16 %v3938_v15, %v3937_v61  ;;  %v3869_v57 = vsel %vm2313_vm6, %v3797_v9, 0.0  ;;  %v3900_v28 = vadd.f32 %v3795_v10, %v3673_v63  ;;  %v3583_v22 = vsel %vm6389_vm4, %v3516_v0, 0.0  ;;  %v1229_v12 = vpop.f32.mrf.mxu1  ;;  %v1381_v25 = vpop.f32.mrf.mxu0 }
 0x201   : > { %v3901_v33 = vadd.f32 %v3869_v57, %v3674_v40  ;;  %v3615_v54 = vadd.f32 %v3583_v22, %v6390_v46  ;;  %v3801_v30 = vsel %vm2712_vm9, %v3798_v3, %v3800_v45  ;;  %v3614_v16 = vadd.f32 %v3514_v44, %v6391_v23 }
 0x202   : > { %4454 = vst [vmem:[%s5916_s17 + $0x50] sm:$0xff] %v4418_v52   ;;  %v3939_v6 = vadd.f32 %v5886_v36, %v3900_v28  ;;  %v3871_v14 = vsel %vm2315_vm12, %v3801_v30, 0.0  ;;  %v3806_v2 = vrot.slane %v4510_v53, 1  ;;  %v3804_v32 = vrot.slane %v4509_v55, 1 }
 0x203   : > { %v3940_v29 = vadd.f32 %v5886_v36, %v3901_v33  ;;  %v3903_v35 = vadd.f32 %v3871_v14, %v3676_v51  ;;  %v6393_v11 = vrot.slane %v5721_v27, 7  ;;  %v3941_v63 = vadd.f32 %v5886_v36, %v3902_v8 }
 0x204   : > { %v3679_v62 = vadd.f32 %v3615_v54, %v1225_v19  ;;  %vm6395_vm6 = vcmp.ge.s32.totalorder %v6394_v31, 0  ;;  %v3518_v41 = vsel %vm2420_vm2, %v3515_v37, %v3517_v18  ;;  %v3807_v17 = vsel %vm2712_vm9, %v3804_v32, %v3806_v2 }
 0x205   : > { %v3520_v3 = vsel %vm2420_vm2, %v3517_v18, %v6393_v11  ;;  %v4423_v24 = vpack.c.bf16 %v3940_v29, %v3939_v6  ;;  %v3942_v40 = vadd.f32 %v5886_v36, %v3903_v35  ;;  %v3909_v56 = vadd.f32 %v5773_v34, %v5941_v7 }
 0x206   : > { %v3585_v43 = vsel %vm6395_vm6, %v3520_v3, 0.0  ;;  %v3616_v21 = vadd.f32 %v3518_v41, %v5763_v48  ;;  %v3809_v55 = vsel %vm2712_vm9, %v3806_v2, %v5724_v59  ;;  %v3802_v61 = vrot.slane %v1381_v25, 1 }
 0x207   : > { %v3617_v49 = vadd.f32 %v3585_v43, %v5782_v13  ;;  %v3677_v51 = vadd.f32 %v3613_v1, %v6068_v47  ;;  %v3678_v26 = vadd.f32 %v3614_v16, %v1219_v4  ;;  %4455 = vst [vmem:[%s5916_s17 + $0x58] sm:$0xff] %v4423_v24   ;;  %v4428_v37 = vpack.c.bf16 %v3942_v40, %v3941_v63 }
 0x208   : > { %v3906_v5 = vadd.f32 %v3807_v17, %v3679_v62  ;;  %v3680_v15 = vadd.f32 %v3616_v21, %v1229_v12  ;;  %v3803_v8 = vsel %vm2712_vm9, %v3800_v45, %v3802_v61  ;;  %v3805_v34 = vsel %vm2712_vm9, %v3802_v61, %v3804_v32 }
 0x209   : > { %v3681_v13 = vadd.f32 %v5721_v27, %v3617_v49  ;;  %4456 = vst [vmem:[%s5916_s17 + $0x60] sm:$0xff] %v4428_v37   ;;  %v3875_v59 = vsel %vm2319_vm13, %v3809_v55, 0.0  ;;  %v3873_v47 = vsel %vm2317_vm10, %v3805_v34, 0.0  ;;  %v3904_v4 = vadd.f32 %v3803_v8, %v3677_v51 }
 0x20a   : > { %v3907_v1 = vadd.f32 %v3875_v59, %v3680_v15  ;;  %v3905_v27 = vadd.f32 %v3873_v47, %v3678_v26  ;;  %v3948_v44 = vadd.f32 %v5886_v36, %v3909_v56 }
 0x20b   : > { %v3908_v48 = vadd.f32 %v5812_v42, %v3681_v13  ;;  %v3943_v39 = vadd.f32 %v5886_v36, %v3904_v4  ;;  %v3945_v42 = vadd.f32 %v5886_v36, %v3906_v5 }
 0x20c   : > { %v3946_v58 = vadd.f32 %v5886_v36, %v3907_v1  ;;  %v3944_v10 = vadd.f32 %v5886_v36, %v3905_v27 }
 0x20d   : > { %v3947_v19 = vadd.f32 %v5886_v36, %v3908_v48 }
 0x20e   : > { %v4438_v0 = vpack.c.bf16 %v3946_v58, %v3945_v42  ;;  %v4433_v45 = vpack.c.bf16 %v3944_v10, %v3943_v39 }
 0x20f   : > { %v4443_v9 = vpack.c.bf16 %v3948_v44, %v3947_v19 }
 0x210   : > { %4458 = vst [vmem:[%s5916_s17 + $0x70] sm:$0xff] %v4438_v0   ;;  %4457 = vst [vmem:[%s5916_s17 + $0x68] sm:$0xff] %v4433_v45  }
 0x211   : > { %4459 = vst [vmem:[%s5916_s17 + $0x78] sm:$0xff] %v4443_v9  }
 0x212   : > { %4596 = shalt.err (!%p4593_p3)
}
 0x213   : > { %s4597_s4 = scalar_lea.hbm %s6146_s16, 2048  ;;  %s4601_s7 = scalar_lea.hbm %s6198_s3, 32768 }
 0x214   : > { %p4598_p4 = scmp.ne.s32.totalorder %s6146_s16, %s4597_s4  ;;  %p4602_p9 = scmp.lt.s32.totalorder %s6146_s16, %s6198_s3 }
 0x215   : > { %p4603_p10 = scmp.lt.s32.totalorder %s4601_s7, %s4597_s4 }
 0x216   : > { %p4599_p7 = pnand %p4598_p4, %p4709_p5 }
 0x217   : > { %p4604_p11 = por %p4603_p10, %p4602_p9 }
 0x218   : > { %p4600_p8 = pneg %p4599_p7 }
 0x21a   : > { %p4605_p12 = pnand %p4604_p11, %p4600_p8 }
 0x21c   : > { %4608 = shalt.err (!%p4605_p12)
}
 0x21d   : > { %s4649_s10 = smov 64   ;;  %s4650_s11 = smov 4  }
 0x21e   : > { %4514 = dma.vmem_to_hbm [thread:$0]  (%p4709_p5), %s6148_s20, 2048, %s6146_s16, %s6155_s26, %s4649_s10, %s4649_s10, %s4650_s11  }
 0x21f PF: > { %p4520_p13 = scmp.ge.s32.totalorder %s4643_s15, 2  ;;  %s4138_s17 = sand.u32 1, %s4631_s12  }
 0x220   : > { %s4139_s19 = scalar_lea.sflag [#allocation4], %s4138_s17 }
 0x221   : > { %p4517_p0 = pnand %p4520_p13, %p4713_p6 }
 0x223   : > { %p4518_p1 = pneg %p4517_p0 }
 0x225   : > { %4626 = dma.done.wait (%p4518_p1), %s4139_s19, 2048  }
 0x226   : > { %4628 = vsyncadd (%p4518_p1), %s4139_s19, 4294965248  ;;  %p13_p2 = scmp.ge.s32.totalorder %s4696_s18, 18   ;;  %s6397_s12 = smov %s4635_s13 }
 0x227   : > { %s6398_s13 = smov %s4639_s14  ;;  %s6399_s14 = smov %s4707_s21 }
 0x228   : > { %s6400_s15 = smov %s4696_s18  ;;  %15 = sbr.rel (!%p13_p2) target bundleno = 3 (0x3), region = 67 }
 0x22d   :  { %4144 = vsyncpa [#allocation4], 1 }
 0x22e   :  { %4146 = vsyncpa [#allocation4 + $0x1], 1 }

</bundles_post_ra>
